<compile_context>
chip_gen: v5e
topology: v5e:2x2
jax: 0.10.0
libtpu: 0.0.40
codegen_flags: <defaults>
</compile_context>

<pallas_src>
import functools

import jax
import jax.numpy as jnp
from jax.experimental import pallas as pl
from jax.experimental.pallas import tpu as pltpu

EPS = 1e-5


def _vmem_limit_bytes() -> int:
    """Scoped-VMEM limit valid on every TPU generation.

    v7x only has 64 MiB of VMEM per TensorCore (v5e/v6e: 128 MiB), so the old
    100 MiB limit was invalid there.  Query the hardware when possible and clamp
    to 48 MiB (the per-call working set of these kernels is < 2 MiB anyway).
    """
    cap = 64 * 1024 * 1024
    try:
        cap = int(getattr(pltpu.get_tpu_info(), "vmem_capacity_bytes", cap) or cap)
    except Exception:
        pass
    return min((cap * 3) // 4, 48 * 1024 * 1024)


_VMEM_LIMIT = _vmem_limit_bytes()


# ----------------------------- Pallas kernels ------------------------------

def _conv_bn_kernel(*refs, relu, has_residual, inv_m):
    """Tiled matmul (K reduction on the grid) + fused BN (+residual) (+ReLU) epilogue.

    grid = (Cout_tiles, K_tiles); M is whole per call so the train-mode BatchNorm
    statistics (per output channel, over all rows) are exact.
    """
    if has_residual:
        a_ref, b_ref, res_ref, o_ref, acc_ref = refs
    else:
        a_ref, b_ref, o_ref, acc_ref = refs
        res_ref = None

    k = pl.program_id(1)

    @pl.when(k == 0)
    def _():
        acc_ref[...] = jnp.zeros_like(acc_ref)

    acc_ref[...] += jnp.dot(a_ref[...], b_ref[...],
                            preferred_element_type=jnp.float32)

    @pl.when(k == pl.num_programs(1) - 1)
    def _():
        y = acc_ref[...]
        # One-pass BN statistics: sum & sum-of-squares -> biased variance
        # (PyTorch train-mode normalization, default affine weight=1 / bias=0).
        s = jnp.sum(y, axis=0, keepdims=True)
        ss = jnp.sum(y * y, axis=0, keepdims=True)
        mean = s * inv_m
        var = jnp.maximum(ss * inv_m - mean * mean, 0.0)
        y = (y - mean) * jax.lax.rsqrt(var + EPS)
        if has_residual:
            y = y + res_ref[...].astype(jnp.float32)
        if relu:
            y = jnp.maximum(y, 0.0)
        o_ref[...] = y.astype(o_ref.dtype)


def _head_kernel(x_ref, w1_ref, w2_ref, b_ref, o_ref, *, n_batch, hw):
    """Fused: global avg-pool + Linear(no bias) + BN1d + ReLU + Linear(+bias)."""
    x = x_ref[...].astype(jnp.float32)                               # (n_batch*hw, C)
    feat = jnp.mean(x.reshape(n_batch, hw, x.shape[-1]), axis=1)     # (n_batch, C)
    h = jnp.dot(feat.astype(jnp.bfloat16), w1_ref[...],
                preferred_element_type=jnp.float32)                  # (n_batch, 512)
    mean = jnp.mean(h, axis=0, keepdims=True)
    var = jnp.maximum(jnp.mean(h * h, axis=0, keepdims=True) - mean * mean, 0.0)
    h = jnp.maximum((h - mean) * jax.lax.rsqrt(var + EPS), 0.0)
    out = jnp.dot(h.astype(jnp.bfloat16), w2_ref[...],
                  preferred_element_type=jnp.float32)                # (n_batch, n_pad)
    o_ref[...] = out + b_ref[...]


# ----------------------------- Pallas wrappers ------------------------------

def _pick_n_tile(n):
    # Prefer 256-wide tiles (v6e/v7x 256x256 MXU); 128 is fine on v5e.
    for d in (256, 128):
        if n % d == 0:
            return d
    return n


def _pick_k_tile(kp):
    # kp is always a multiple of 128; pick the largest 128-multiple divisor <= 1024.
    d = min(kp, 1024)
    while d >= 128:
        if kp % d == 0:
            return d
        d -= 128
    return kp


def matmul_bn(a, w, *, relu, residual=None):
    """a: (M, Kp) bf16, w: (Kp, Cout) bf16 -> BN(a@w) [+residual] [+ReLU], bf16 (M, Cout)."""
    M, Kp = a.shape
    Cout = w.shape[1]
    tn = _pick_n_tile(Cout)
    tk = _pick_k_tile(Kp)
    n_n, n_k = Cout // tn, Kp // tk

    in_specs = [pl.BlockSpec((M, tk), lambda n, k: (0, k)),
                pl.BlockSpec((tk, tn), lambda n, k: (k, n))]
    args = [a, w]
    if residual is not None:
        in_specs.append(pl.BlockSpec((M, tn), lambda n, k: (0, n)))
        args.append(residual)

    bytes_accessed = (a.size * a.dtype.itemsize * n_n
                      + w.size * w.dtype.itemsize
                      + M * Cout * 2
                      + (0 if residual is None else residual.size * residual.dtype.itemsize))
    cost = pl.CostEstimate(flops=2 * M * Kp * Cout, transcendentals=0,
                           bytes_accessed=int(bytes_accessed))

    return pl.pallas_call(
        functools.partial(_conv_bn_kernel, relu=relu,
                          has_residual=residual is not None, inv_m=1.0 / M),
        out_shape=jax.ShapeDtypeStruct((M, Cout), jnp.bfloat16),
        grid=(n_n, n_k),
        in_specs=in_specs,
        out_specs=pl.BlockSpec((M, tn), lambda n, k: (0, n)),
        scratch_shapes=[pltpu.VMEM((M, tn), jnp.float32)],
        compiler_params=pltpu.CompilerParams(
            dimension_semantics=("parallel", "arbitrary"),
            vmem_limit_bytes=_VMEM_LIMIT),
        cost_estimate=cost,
    )(*args)


def head_forward(x_flat, w1, w2, b, *, n_batch, hw, embed_dim):
    C = x_flat.shape[1]
    n_pad = w2.shape[1]
    out = pl.pallas_call(
        functools.partial(_head_kernel, n_batch=n_batch, hw=hw),
        out_shape=jax.ShapeDtypeStruct((n_batch, n_pad), jnp.float32),
        grid=(1,),
        in_specs=[pl.BlockSpec((n_batch * hw, C), lambda i: (0, 0)),
                  pl.BlockSpec(w1.shape, lambda i: (0, 0)),
                  pl.BlockSpec(w2.shape, lambda i: (0, 0)),
                  pl.BlockSpec(b.shape, lambda i: (0, 0))],
        out_specs=pl.BlockSpec((n_batch, n_pad), lambda i: (0, 0)),
        compiler_params=pltpu.CompilerParams(vmem_limit_bytes=_VMEM_LIMIT),
    )(x_flat, w1, w2, b)
    return out[:, :embed_dim]


# ----------------------------- JAX glue (im2col, blocks) --------------------

def im2col(x, k, stride, padding):
    """x: (N, H, W, C) bf16 -> (N*Ho*Wo, k*k*C), channel order (kh, kw, c)."""
    N, H, W, C = x.shape
    if padding:
        x = jnp.pad(x, ((0, 0), (padding, padding), (padding, padding), (0, 0)))
    Ho = (H + 2 * padding - k) // stride + 1
    Wo = (W + 2 * padding - k) // stride + 1
    cols = []
    for i in range(k):
        for j in range(k):
            cols.append(x[:, i:i + (Ho - 1) * stride + 1:stride,
                          j:j + (Wo - 1) * stride + 1:stride, :])
    patches = cols[0] if len(cols) == 1 else jnp.concatenate(cols, axis=-1)
    return patches.reshape(N * Ho * Wo, k * k * C), Ho, Wo


def conv_bn_relu(x, conv, *, stride, padding, relu, residual=None):
    """x: (N,H,W,C) bf16; conv = {'w': (Kp, Cout) bf16, 'k': kernel size}."""
    w, k = conv['w'], conv['k']
    Kp, Cout = w.shape
    N = x.shape[0]
    a, Ho, Wo = im2col(x, k, stride, padding)
    if a.shape[1] < Kp:                                   # pad K to a lane-aligned 128-multiple
        a = jnp.pad(a, ((0, 0), (0, Kp - a.shape[1])))
    y = matmul_bn(a, w, relu=relu, residual=residual)
    return y.reshape(N, Ho, Wo, Cout)


def basic_block(x, blk):
    s = blk['stride']
    out = conv_bn_relu(x, blk['conv1'], stride=s, padding=1, relu=True)
    if 'downsample' in blk:
        identity = conv_bn_relu(x, blk['downsample'], stride=s, padding=0, relu=False)
    else:
        identity = x
    Ni, Hi, Wi, Ci = identity.shape
    # conv2 + BN + residual add + ReLU fused in one kernel epilogue
    out = conv_bn_relu(out, blk['conv2'], stride=1, padding=1, relu=True,
                       residual=identity.reshape(Ni * Hi * Wi, Ci))
    return out


def resnet_forward(params, x_nchw):
    x = jnp.transpose(x_nchw, (0, 2, 3, 1)).astype(jnp.bfloat16)      # NCHW -> NHWC, bf16
    # stem: conv 3x3 s1 p1 + BN + ReLU (maxpool removed by the module)
    x = conv_bn_relu(x, params['conv1'], stride=1, padding=1, relu=True)
    for blocks in params['layers']:
        for blk in blocks:
            x = basic_block(x, blk)
    N, H, W, C = x.shape
    # fused: AdaptiveAvgPool2d((1,1)) + Flatten + Linear + BN1d + ReLU + Linear(+bias)
    return head_forward(x.reshape(N * H * W, C), params['fc1_w'], params['fc2_w'],
                        params['fc2_b'], n_batch=N, hw=H * W,
                        embed_dim=params['embed_dim'])


# ----------------------------- deterministic params -------------------------

def _round_up(n, m):
    return ((n + m - 1) // m) * m


def _prep_conv(w):
    """PyTorch conv weight (Cout, Cin, k, k) -> (Kp, Cout) bf16 with K padded to 128n."""
    cout, cin, kh, kw = w.shape
    K = kh * kw * cin
    Kp = _round_up(K, 128)
    wk = jnp.transpose(w, (2, 3, 1, 0)).reshape(K, cout)
    wk = jnp.pad(wk, ((0, Kp - K), (0, 0))).astype(jnp.bfloat16)
    return {'w': wk, 'k': kh}


def init_params(key, in_channels, embed_dim):
    keys = iter(jax.random.split(key, 64))

    def conv(cout, cin, k):
        return jax.random.normal(next(keys), (cout, cin, k, k), jnp.float32) * 0.05

    params = {'conv1': _prep_conv(conv(64, in_channels, 3)), 'embed_dim': embed_dim}
    inplanes = 64
    layers = []
    for planes, nblocks, stride in [(64, 2, 1), (128, 2, 2), (256, 2, 2), (512, 2, 2)]:
        blocks = []
        for b in range(nblocks):
            s = stride if b == 0 else 1
            blk = {'conv1': _prep_conv(conv(planes, inplanes, 3)),
                   'conv2': _prep_conv(conv(planes, planes, 3)),
                   'stride': s}
            if s != 1 or inplanes != planes:
                blk['downsample'] = _prep_conv(conv(planes, inplanes, 1))
            inplanes = planes
            blocks.append(blk)
        layers.append(blocks)
    params['layers'] = layers

    # head: Linear(512->512, bias=False) + BN1d + ReLU, Linear(512->embed_dim) + bias.
    # Pre-transposed at init; second linear padded to a lane-dense 128 output.
    fc1 = jax.random.normal(next(keys), (512, 512), jnp.float32) * 0.05
    fc2 = jax.random.normal(next(keys), (embed_dim, 512), jnp.float32) * 0.05
    b2 = jax.random.normal(next(keys), (embed_dim,), jnp.float32) * 0.05
    n_pad = _round_up(max(embed_dim, 128), 128)
    params['fc1_w'] = fc1.T.astype(jnp.bfloat16)                                    # (512, 512)
    params['fc2_w'] = jnp.pad(fc2.T, ((0, 0), (0, n_pad - embed_dim))).astype(jnp.bfloat16)
    params['fc2_b'] = jnp.pad(b2, (0, n_pad - embed_dim)).reshape(1, n_pad)         # f32
    return params


# ----------------------------- main ------------------------------------------

if __name__ == "__main__":
    key = jax.random.PRNGKey(0)
    k_param, k_x = jax.random.split(key)

    batch, in_channels, spatial, embed_dim = 2, 3, 16, 32
    params = init_params(k_param, in_channels, embed_dim)
    x = jax.random.normal(k_x, (batch, in_channels, spatial, spatial), jnp.float32)

    out = resnet_forward(params, x)
    out = jax.block_until_ready(out)
    assert out.shape == (batch, embed_dim), out.shape
    assert jnp.all(jnp.isfinite(out))
    print("KERNEL_OK")
</pallas_src>

<mosaic_0001>
module attributes {stable_mosaic.version = 11 : i64} {
  func.func @_conv_bn_kernel(%arg0: i32, %arg1: i32, %arg2: memref<512x128xbf16, #tpu.memory_space<vmem>>, %arg3: memref<128x64xbf16, #tpu.memory_space<vmem>>, %arg4: memref<512x64xbf16, #tpu.memory_space<vmem>>, %arg5: memref<512x64xf32, #tpu.memory_space<vmem>>) attributes {dimension_semantics = [#tpu.dimension_semantics<parallel>, #tpu.dimension_semantics<arbitrary>], iteration_bounds = array<i64: 1, 1>, scalar_prefetch = 0 : i64, scratch_operands = 1 : i64, tpu.core_type = #tpu.core_type<tc>, window_params = [{transform_indices = @transform_0, window_bounds = array<i64: 512, 128>}, {transform_indices = @transform_1, window_bounds = array<i64: 128, 64>}, {transform_indices = @transform_2, window_bounds = array<i64: 512, 64>}]} {
    %c0_i32 = arith.constant 0 : i32
    %0 = arith.cmpi eq, %arg1, %c0_i32 : i32
    %1 = arith.extui %0 : i1 to i32
    %c0_i32_0 = arith.constant 0 : i32
    %2 = arith.cmpi ne, %1, %c0_i32_0 : i32
    scf.if %2 {
      %cst_10 = arith.constant 0.000000e+00 : f32
      %12 = vector.broadcast %cst_10 : f32 to vector<512x64xf32>
      %c0_11 = arith.constant 0 : index
      %c0_12 = arith.constant 0 : index
      %13 = vector.load %arg5[%c0_11, %c0_12] : memref<512x64xf32, #tpu.memory_space<vmem>>, vector<512x64xf32>
      tpu.vector_store %arg5[%c0_11, %c0_12], %12 {strides = array<i32>} : memref<512x64xf32, #tpu.memory_space<vmem>>, vector<512x64xf32>,
    } else {
    }
    %c0 = arith.constant 0 : index
    %c0_1 = arith.constant 0 : index
    %3 = vector.load %arg5[%c0, %c0_1] : memref<512x64xf32, #tpu.memory_space<vmem>>, vector<512x64xf32>
    %c0_2 = arith.constant 0 : index
    %c0_3 = arith.constant 0 : index
    %4 = vector.load %arg2[%c0_2, %c0_3] : memref<512x128xbf16, #tpu.memory_space<vmem>>, vector<512x128xbf16>
    %c0_4 = arith.constant 0 : index
    %c0_5 = arith.constant 0 : index
    %5 = vector.load %arg3[%c0_4, %c0_5] : memref<128x64xbf16, #tpu.memory_space<vmem>>, vector<128x64xbf16>
    %cst = arith.constant dense<0.000000e+00> : vector<512x64xf32>
    %6 = tpu.matmul %4, %5, %cst {dimension_numbers = #tpu.dot_dimension_numbers<[1], [0], [0], [1], [0, 0, 1, 1], [], []>} : vector<512x128xbf16>, vector<128x64xbf16>, vector<512x64xf32> -> vector<512x64xf32>
    %7 = arith.addf %3, %6 : vector<512x64xf32>
    %c0_6 = arith.constant 0 : index
    %c0_7 = arith.constant 0 : index
    %8 = vector.load %arg5[%c0_6, %c0_7] : memref<512x64xf32, #tpu.memory_space<vmem>>, vector<512x64xf32>
    tpu.vector_store %arg5[%c0_6, %c0_7], %7 {strides = array<i32>} : memref<512x64xf32, #tpu.memory_space<vmem>>, vector<512x64xf32>,
    %c0_i32_8 = arith.constant 0 : i32
    %9 = arith.cmpi eq, %arg1, %c0_i32_8 : i32
    %10 = arith.extui %9 : i1 to i32
    %c0_i32_9 = arith.constant 0 : i32
    %11 = arith.cmpi ne, %10, %c0_i32_9 : i32
    scf.if %11 {
      %c0_10 = arith.constant 0 : index
      %c0_11 = arith.constant 0 : index
      %12 = vector.load %arg5[%c0_10, %c0_11] : memref<512x64xf32, #tpu.memory_space<vmem>>, vector<512x64xf32>
      %cst_12 = arith.constant dense<0.000000e+00> : vector<64xf32>
      %13 = vector.multi_reduction <add>, %12, %cst_12 [0] : vector<512x64xf32> to vector<64xf32>
      %14 = vector.shape_cast %13 : vector<64xf32> to vector<1x64xf32>
      %15 = arith.mulf %12, %12 : vector<512x64xf32>
      %cst_13 = arith.constant dense<0.000000e+00> : vector<64xf32>
      %16 = vector.multi_reduction <add>, %15, %cst_13 [0] : vector<512x64xf32> to vector<64xf32>
      %17 = vector.shape_cast %16 : vector<64xf32> to vector<1x64xf32>
      %cst_14 = arith.constant 0.001953125 : f32
      %18 = vector.broadcast %cst_14 : f32 to vector<1x64xf32>
      %19 = arith.mulf %14, %18 : vector<1x64xf32>
      %cst_15 = arith.constant 0.001953125 : f32
      %20 = vector.broadcast %cst_15 : f32 to vector<1x64xf32>
      %21 = arith.mulf %17, %20 : vector<1x64xf32>
      %22 = arith.mulf %19, %19 : vector<1x64xf32>
      %23 = arith.subf %21, %22 : vector<1x64xf32>
      %cst_16 = arith.constant 0.000000e+00 : f32
      %24 = vector.broadcast %cst_16 : f32 to vector<1x64xf32>
      %25 = arith.maximumf %23, %24 : vector<1x64xf32>
      %26 = vector.broadcast %19 : vector<1x64xf32> to vector<512x64xf32>
      %27 = arith.subf %12, %26 : vector<512x64xf32>
      %cst_17 = arith.constant 9.99999974E-6 : f32
      %28 = vector.broadcast %cst_17 : f32 to vector<1x64xf32>
      %29 = arith.addf %25, %28 : vector<1x64xf32>
      %30 = math.rsqrt %29 : vector<1x64xf32>
      %31 = vector.broadcast %30 : vector<1x64xf32> to vector<512x64xf32>
      %32 = arith.mulf %27, %31 : vector<512x64xf32>
      %cst_18 = arith.constant 0.000000e+00 : f32
      %33 = vector.broadcast %cst_18 : f32 to vector<512x64xf32>
      %34 = arith.maximumf %32, %33 : vector<512x64xf32>
      %35 = arith.truncf %34 : vector<512x64xf32> to vector<512x64xbf16>
      %c0_19 = arith.constant 0 : index
      %c0_20 = arith.constant 0 : index
      %36 = vector.load %arg4[%c0_19, %c0_20] : memref<512x64xbf16, #tpu.memory_space<vmem>>, vector<512x64xbf16>
      tpu.vector_store %arg4[%c0_19, %c0_20], %35 {strides = array<i32>} : memref<512x64xbf16, #tpu.memory_space<vmem>>, vector<512x64xbf16>,
    } else {
    }
    return
  }
  func.func @transform_0(%arg0: i32, %arg1: i32) -> (i32, i32) {
    %c0_i32 = arith.constant 0 : i32
    %c0_i32_0 = arith.constant 0 : i32
    return %c0_i32, %arg1 : i32, i32
  }
  func.func @transform_1(%arg0: i32, %arg1: i32) -> (i32, i32) {
    %c0_i32 = arith.constant 0 : i32
    return %arg1, %arg0 : i32, i32
  }
  func.func @transform_2(%arg0: i32, %arg1: i32) -> (i32, i32) {
    %c0_i32 = arith.constant 0 : i32
    %c0_i32_0 = arith.constant 0 : i32
    return %c0_i32, %arg0 : i32, i32
  }
}

</mosaic_0001>

<bundles_post_ra>
// kernel: tpu_custom_call.1
= control target key start
LH: loop header
LB: loop body
LE: loop exit
PB: predicated region body
PF: predicated region fallthrough
CT: control target
= control target key end

     0   :  { %7 = vsyncpa [#allocation4], 0  ;;  %s1779_s12 = smov [#allocation3]   ;;  %s1780_s14 = smov 64   ;;  %s2889_s0 = inlined_call_operand.hbm [shape: bf16[512,128], index: 0, kind: input, shape index: {}]   ;;  %s2890_s1 = inlined_call_operand.vmem [shape: bf16[128,64], index: 1, kind: input, shape index: {}]   ;;  %s2891_s2 = inlined_call_operand.vmem [shape: bf16[512,64], index: 2, kind: output, shape index: {}]  }
   0x1   :  { %s12_s11 = sshll.u32 %s2889_s0, 4  ;;  %s14_s13 = sshll.u32 %s1779_s12, 4  ;;  %s13_s11 = int_to_ptr.hbm [resolvable:$true] %s12_s11  ;;  %s15_s13 = int_to_ptr.vmem [resolvable:$true] %s14_s13 }
   0x2   :  { %s1781_s15 = smov 4  }
   0x3   :  { %20 = dma.hbm_to_vmem [thread:$0]  %s13_s11, 4096, %s15_s13, [#allocation4], %s1780_s14, %s1780_s14, %s1781_s15  }
   0x4   :  { %1777 = dma.done.wait [#allocation4], 4096  }
   0x5   :  { %1778 = vsyncadd [#allocation4], 4294963200  ;;  %v1716_v0 = vld [vmem:[%s2890_s1 + $0x38] sm:$0xff]  ;;  %v1715_v1 = vld [vmem:[%s2890_s1 + $0x30] sm:$0xff]  ;;  %vm31_vm0 = vcmask 523264   ;;  %v1782_v28 = vmov 0.0  }
   0x6   :  { %480 = vmatpush.bf16.msra.mxu0 %v1716_v0  ;;  %1717 = vmatpush.bf16.msra.mxu1 %v1716_v0  ;;  %v1714_v2 = vld [vmem:[%s2890_s1 + $0x28] sm:$0xff]  ;;  %v1713_v3 = vld [vmem:[%s2890_s1 + $0x20] sm:$0xff]  ;;  %v1712_v4 = vld [vmem:[%s2890_s1 + $0x18] sm:$0xff]  ;;  %32 = vst.msk [vmem:[#allocation2] sm:$0xff] %vm31_vm0, %v1782_v28  ;;  %vm1447_vm4 = vcmask 519168  }
   0x7   :  { %1718 = vmatpush.bf16.msra.mxu2 %v1716_v0  ;;  %1719 = vmatpush.bf16.msra.mxu3 %v1716_v0  ;;  %v1711_v5 = vld [vmem:[%s2890_s1 + $0x10] sm:$0xff]  ;;  %v1710_v6 = vld [vmem:[%s2890_s1 + $0x8] sm:$0xff]  ;;  %v1709_v7 = vld [vmem:[%s2890_s1] sm:$0xff]  ;;  %33 = vst.msk [vmem:[#allocation2 + $0x8] sm:$0xff] %vm31_vm0, %v1782_v28 }
   0x8   :  { %v1677_v8 = vld [vmem:[#allocation3] sm:$0xff]  ;;  %v1678_v10 = vld [vmem:[#allocation3 + $0x8] sm:$0xff]  ;;  %v1679_v13 = vld [vmem:[#allocation3 + $0x10] sm:$0xff]  ;;  %34 = vst.msk [vmem:[#allocation2 + $0x10] sm:$0xff] %vm31_vm0, %v1782_v28 }
   0x9   :  { %v1685_v9 = vld [vmem:[#allocation3 + $0x40] sm:$0xff]  ;;  %v1686_v11 = vld [vmem:[#allocation3 + $0x48] sm:$0xff]  ;;  %v1687_v14 = vld [vmem:[#allocation3 + $0x50] sm:$0xff]  ;;  %35 = vst.msk [vmem:[#allocation2 + $0x18] sm:$0xff] %vm31_vm0, %v1782_v28 }
   0xa   :  { %481 = vmatpush.bf16.msra.mxu0 %v1715_v1  ;;  %1720 = vmatpush.bf16.msra.mxu1 %v1715_v1  ;;  %v1693_v12 = vld [vmem:[#allocation3 + $0x80] sm:$0xff]  ;;  %v1694_v15 = vld [vmem:[#allocation3 + $0x88] sm:$0xff]  ;;  %v1680_v16 = vld [vmem:[#allocation3 + $0x18] sm:$0xff]  ;;  %36 = vst.msk [vmem:[#allocation2 + $0x20] sm:$0xff] %vm31_vm0, %v1782_v28 }
   0xb   :  { %1721 = vmatpush.bf16.msra.mxu2 %v1715_v1  ;;  %1722 = vmatpush.bf16.msra.mxu3 %v1715_v1  ;;  %v1688_v17 = vld [vmem:[#allocation3 + $0x58] sm:$0xff]  ;;  %v1695_v18 = vld [vmem:[#allocation3 + $0x90] sm:$0xff]  ;;  %v1701_v19 = vld [vmem:[#allocation3 + $0xc0] sm:$0xff]  ;;  %37 = vst.msk [vmem:[#allocation2 + $0x28] sm:$0xff] %vm31_vm0, %v1782_v28 }
   0xc   :  { %v1681_v20 = vld [vmem:[#allocation3 + $0x20] sm:$0xff]  ;;  %v1696_v22 = vld [vmem:[#allocation3 + $0x98] sm:$0xff]  ;;  %v1702_v23 = vld [vmem:[#allocation3 + $0xc8] sm:$0xff]  ;;  %38 = vst.msk [vmem:[#allocation2 + $0x30] sm:$0xff] %vm31_vm0, %v1782_v28 }
   0xd   :  { %v1689_v21 = vld [vmem:[#allocation3 + $0x60] sm:$0xff]  ;;  %v1682_v24 = vld [vmem:[#allocation3 + $0x28] sm:$0xff]  ;;  %v1703_v27 = vld [vmem:[#allocation3 + $0xd0] sm:$0xff]  ;;  %39 = vst.msk [vmem:[#allocation2 + $0x38] sm:$0xff] %vm31_vm0, %v1782_v28 }
   0xe   :  { %482 = vmatpush.bf16.msra.mxu0 %v1714_v2  ;;  %1723 = vmatpush.bf16.msra.mxu1 %v1714_v2  ;;  %v1690_v25 = vld [vmem:[#allocation3 + $0x68] sm:$0xff]  ;;  %v1697_v26 = vld [vmem:[#allocation3 + $0xa0] sm:$0xff]  ;;  %40 = vst.msk [vmem:[#allocation2 + $0x40] sm:$0xff] %vm31_vm0, %v1782_v28  ;;  %v1683_v29 = vld [vmem:[#allocation3 + $0x30] sm:$0xff] }
   0xf   :  { %1724 = vmatpush.bf16.msra.mxu2 %v1714_v2  ;;  %1725 = vmatpush.bf16.msra.mxu3 %v1714_v2  ;;  %41 = vst.msk [vmem:[#allocation2 + $0x48] sm:$0xff] %vm31_vm0, %v1782_v28  ;;  %v1691_v30 = vld [vmem:[#allocation3 + $0x70] sm:$0xff]  ;;  %v1698_v31 = vld [vmem:[#allocation3 + $0xa8] sm:$0xff]  ;;  %v1704_v32 = vld [vmem:[#allocation3 + $0xd8] sm:$0xff] }
  0x10   :  { %42 = vst.msk [vmem:[#allocation2 + $0x50] sm:$0xff] %vm31_vm0, %v1782_v28  ;;  %v1684_v33 = vld [vmem:[#allocation3 + $0x38] sm:$0xff]  ;;  %v1699_v35 = vld [vmem:[#allocation3 + $0xb0] sm:$0xff]  ;;  %v1705_v36 = vld [vmem:[#allocation3 + $0xe0] sm:$0xff] }
  0x11   :  { %43 = vst.msk [vmem:[#allocation2 + $0x58] sm:$0xff] %vm31_vm0, %v1782_v28  ;;  %v1692_v34 = vld [vmem:[#allocation3 + $0x78] sm:$0xff]  ;;  %v96_v37 = vld [vmem:[#allocation2] sm:$0xff]  ;;  %v1706_v44 = vld [vmem:[#allocation3 + $0xe8] sm:$0xff] }
  0x12   :  { %483 = vmatpush.bf16.msra.mxu0 %v1713_v3  ;;  %1726 = vmatpush.bf16.msra.mxu1 %v1713_v3  ;;  %44 = vst.msk [vmem:[#allocation2 + $0x60] sm:$0xff] %vm31_vm0, %v1782_v28  ;;  %v1700_v43 = vld [vmem:[#allocation3 + $0xb8] sm:$0xff]  ;;  %v97_v45 = vld [vmem:[#allocation2 + $0x8] sm:$0xff]  ;;  %v98_v46 = vld [vmem:[#allocation2 + $0x10] sm:$0xff] }
  0x13   :  { %1727 = vmatpush.bf16.msra.mxu2 %v1713_v3  ;;  %1728 = vmatpush.bf16.msra.mxu3 %v1713_v3  ;;  %45 = vst.msk [vmem:[#allocation2 + $0x68] sm:$0xff] %vm31_vm0, %v1782_v28  ;;  %v99_v55 = vld [vmem:[#allocation2 + $0x18] sm:$0xff]  ;;  %v1707_v63 = vld [vmem:[#allocation3 + $0xf0] sm:$0xff]  ;;  %v100_v0 = vld [vmem:[#allocation2 + $0x20] sm:$0xff] }
  0x14   :  { %46 = vst.msk [vmem:[#allocation2 + $0x70] sm:$0xff] %vm31_vm0, %v1782_v28 }
  0x15   :  { %47 = vst.msk [vmem:[#allocation2 + $0x78] sm:$0xff] %vm31_vm0, %v1782_v28 }
  0x16   :  { %484 = vmatpush.bf16.msra.mxu0 %v1712_v4  ;;  %1729 = vmatpush.bf16.msra.mxu1 %v1712_v4  ;;  %48 = vst.msk [vmem:[#allocation2 + $0x80] sm:$0xff] %vm31_vm0, %v1782_v28 }
  0x17   :  { %1730 = vmatpush.bf16.msra.mxu2 %v1712_v4  ;;  %1731 = vmatpush.bf16.msra.mxu3 %v1712_v4  ;;  %49 = vst.msk [vmem:[#allocation2 + $0x88] sm:$0xff] %vm31_vm0, %v1782_v28 }
  0x18   :  { %50 = vst.msk [vmem:[#allocation2 + $0x90] sm:$0xff] %vm31_vm0, %v1782_v28 }
  0x19   :  { %51 = vst.msk [vmem:[#allocation2 + $0x98] sm:$0xff] %vm31_vm0, %v1782_v28 }
  0x1a   :  { %485 = vmatpush.bf16.msra.mxu0 %v1711_v5  ;;  %1732 = vmatpush.bf16.msra.mxu1 %v1711_v5  ;;  %52 = vst.msk [vmem:[#allocation2 + $0xa0] sm:$0xff] %vm31_vm0, %v1782_v28 }
  0x1b   :  { %1733 = vmatpush.bf16.msra.mxu2 %v1711_v5  ;;  %1734 = vmatpush.bf16.msra.mxu3 %v1711_v5  ;;  %53 = vst.msk [vmem:[#allocation2 + $0xa8] sm:$0xff] %vm31_vm0, %v1782_v28  ;;  %v101_v5 = vld [vmem:[#allocation2 + $0x28] sm:$0xff] }
  0x1c   :  { %54 = vst.msk [vmem:[#allocation2 + $0xb0] sm:$0xff] %vm31_vm0, %v1782_v28 }
  0x1d   :  { %55 = vst.msk [vmem:[#allocation2 + $0xb8] sm:$0xff] %vm31_vm0, %v1782_v28  ;;  %v112_v48 = vld [vmem:[#allocation2 + $0x80] sm:$0xff] }
  0x1e   :  { %486 = vmatpush.bf16.msra.mxu0 %v1710_v6  ;;  %1735 = vmatpush.bf16.msra.mxu1 %v1710_v6  ;;  %56 = vst.msk [vmem:[#allocation2 + $0xc0] sm:$0xff] %vm31_vm0, %v1782_v28  ;;  %v113_v50 = vld [vmem:[#allocation2 + $0x88] sm:$0xff] }
  0x1f   :  { %1736 = vmatpush.bf16.msra.mxu2 %v1710_v6  ;;  %1737 = vmatpush.bf16.msra.mxu3 %v1710_v6  ;;  %57 = vst.msk [vmem:[#allocation2 + $0xc8] sm:$0xff] %vm31_vm0, %v1782_v28  ;;  %v114_v56 = vld [vmem:[#allocation2 + $0x90] sm:$0xff] }
  0x20   :  { %58 = vst.msk [vmem:[#allocation2 + $0xd0] sm:$0xff] %vm31_vm0, %v1782_v28  ;;  %v115_v60 = vld [vmem:[#allocation2 + $0x98] sm:$0xff] }
  0x21   :  { %59 = vst.msk [vmem:[#allocation2 + $0xd8] sm:$0xff] %vm31_vm0, %v1782_v28  ;;  %v116_v6 = vld [vmem:[#allocation2 + $0xa0] sm:$0xff] }
  0x22   :  { %487 = vmatpush.bf16.msra.mxu0 %v1709_v7  ;;  %1738 = vmatpush.bf16.msra.mxu1 %v1709_v7  ;;  %60 = vst.msk [vmem:[#allocation2 + $0xe0] sm:$0xff] %vm31_vm0, %v1782_v28 }
  0x23   :  { %1739 = vmatpush.bf16.msra.mxu2 %v1709_v7  ;;  %1740 = vmatpush.bf16.msra.mxu3 %v1709_v7  ;;  %61 = vst.msk [vmem:[#allocation2 + $0xe8] sm:$0xff] %vm31_vm0, %v1782_v28 }
  0x24   :  { %62 = vst.msk [vmem:[#allocation2 + $0xf0] sm:$0xff] %vm31_vm0, %v1782_v28 }
  0x25   :  { %488 = vmatmul.bf16.vlgmr.msra.gmra.mxu0 %v1677_v8  ;;  %528 = vmatmul.bf16.vlgmr.msra.gmra.mxu1 %v1685_v9  ;;  %63 = vst.msk [vmem:[#allocation2 + $0xf8] sm:$0xff] %vm31_vm0, %v1782_v28 }
  0x26   :  { %568 = vmatmul.bf16.vlgmr.msra.gmra.mxu2 %v1693_v12  ;;  %608 = vmatmul.bf16.vlgmr.msra.gmra.mxu3 %v1701_v19  ;;  %64 = vst.msk [vmem:[#allocation2 + $0x100] sm:$0xff] %vm31_vm0, %v1782_v28  ;;  %v117_v12 = vld [vmem:[#allocation2 + $0xa8] sm:$0xff]  ;;  %v102_v19 = vld [vmem:[#allocation2 + $0x30] sm:$0xff] }
  0x27   :  { %65 = vst.msk [vmem:[#allocation2 + $0x108] sm:$0xff] %vm31_vm0, %v1782_v28 }
  0x28   :  { %66 = vst.msk [vmem:[#allocation2 + $0x110] sm:$0xff] %vm31_vm0, %v1782_v28 }
  0x29   :  { %67 = vst.msk [vmem:[#allocation2 + $0x118] sm:$0xff] %vm31_vm0, %v1782_v28 }
  0x2a   :  { %68 = vst.msk [vmem:[#allocation2 + $0x120] sm:$0xff] %vm31_vm0, %v1782_v28 }
  0x2b   :  { %69 = vst.msk [vmem:[#allocation2 + $0x128] sm:$0xff] %vm31_vm0, %v1782_v28 }
  0x2c   :  { %70 = vst.msk [vmem:[#allocation2 + $0x130] sm:$0xff] %vm31_vm0, %v1782_v28 }
  0x2d   :  { %71 = vst.msk [vmem:[#allocation2 + $0x138] sm:$0xff] %vm31_vm0, %v1782_v28  ;;  %v128_v7 = vld [vmem:[#allocation2 + $0x100] sm:$0xff] }
  0x2e   :  { %72 = vst.msk [vmem:[#allocation2 + $0x140] sm:$0xff] %vm31_vm0, %v1782_v28 }
  0x2f   :  { %73 = vst.msk [vmem:[#allocation2 + $0x148] sm:$0xff] %vm31_vm0, %v1782_v28 }
  0x30   :  { %74 = vst.msk [vmem:[#allocation2 + $0x150] sm:$0xff] %vm31_vm0, %v1782_v28 }
  0x31   :  { %75 = vst.msk [vmem:[#allocation2 + $0x158] sm:$0xff] %vm31_vm0, %v1782_v28 }
  0x32   :  { %76 = vst.msk [vmem:[#allocation2 + $0x160] sm:$0xff] %vm31_vm0, %v1782_v28 }
  0x33   :  { %77 = vst.msk [vmem:[#allocation2 + $0x168] sm:$0xff] %vm31_vm0, %v1782_v28 }
  0x34   :  { %78 = vst.msk [vmem:[#allocation2 + $0x170] sm:$0xff] %vm31_vm0, %v1782_v28 }
  0x35   :  { %493 = vmatmul.bf16.gmra.mxu0 %v1678_v10  ;;  %533 = vmatmul.bf16.gmra.mxu1 %v1686_v11  ;;  %79 = vst.msk [vmem:[#allocation2 + $0x178] sm:$0xff] %vm31_vm0, %v1782_v28 }
  0x36   :  { %573 = vmatmul.bf16.gmra.mxu2 %v1694_v15  ;;  %613 = vmatmul.bf16.gmra.mxu3 %v1702_v23  ;;  %80 = vst.msk [vmem:[#allocation2 + $0x180] sm:$0xff] %vm31_vm0, %v1782_v28 }
  0x37   :  { %81 = vst.msk [vmem:[#allocation2 + $0x188] sm:$0xff] %vm31_vm0, %v1782_v28 }
  0x38   :  { %82 = vst.msk [vmem:[#allocation2 + $0x190] sm:$0xff] %vm31_vm0, %v1782_v28 }
  0x39   :  { %83 = vst.msk [vmem:[#allocation2 + $0x198] sm:$0xff] %vm31_vm0, %v1782_v28 }
  0x3a   :  { %84 = vst.msk [vmem:[#allocation2 + $0x1a0] sm:$0xff] %vm31_vm0, %v1782_v28 }
  0x3b   :  { %85 = vst.msk [vmem:[#allocation2 + $0x1a8] sm:$0xff] %vm31_vm0, %v1782_v28 }
  0x3c   :  { %86 = vst.msk [vmem:[#allocation2 + $0x1b0] sm:$0xff] %vm31_vm0, %v1782_v28 }
  0x3d   :  { %87 = vst.msk [vmem:[#allocation2 + $0x1b8] sm:$0xff] %vm31_vm0, %v1782_v28 }
  0x3e   :  { %88 = vst.msk [vmem:[#allocation2 + $0x1c0] sm:$0xff] %vm31_vm0, %v1782_v28 }
  0x3f   :  { %89 = vst.msk [vmem:[#allocation2 + $0x1c8] sm:$0xff] %vm31_vm0, %v1782_v28 }
  0x40   :  { %90 = vst.msk [vmem:[#allocation2 + $0x1d0] sm:$0xff] %vm31_vm0, %v1782_v28 }
  0x41   :  { %91 = vst.msk [vmem:[#allocation2 + $0x1d8] sm:$0xff] %vm31_vm0, %v1782_v28 }
  0x42   :  { %92 = vst.msk [vmem:[#allocation2 + $0x1e0] sm:$0xff] %vm31_vm0, %v1782_v28 }
  0x43   :  { %93 = vst.msk [vmem:[#allocation2 + $0x1e8] sm:$0xff] %vm31_vm0, %v1782_v28 }
  0x44   :  { %94 = vst.msk [vmem:[#allocation2 + $0x1f0] sm:$0xff] %vm31_vm0, %v1782_v28 }
  0x45   :  { %498 = vmatmul.bf16.gmra.mxu0 %v1679_v13  ;;  %538 = vmatmul.bf16.gmra.mxu1 %v1687_v14  ;;  %95 = vst.msk [vmem:[#allocation2 + $0x1f8] sm:$0xff] %vm31_vm0, %v1782_v28  ;;  %v129_v14 = vld [vmem:[#allocation2 + $0x108] sm:$0xff] }
  0x46   :  { %578 = vmatmul.bf16.gmra.mxu2 %v1695_v18  ;;  %618 = vmatmul.bf16.gmra.mxu3 %v1703_v27  ;;  %v1708_v18 = vld [vmem:[#allocation3 + $0xf8] sm:$0xff] }
  0x55   :  { %503 = vmatmul.bf16.gmra.mxu0 %v1680_v16  ;;  %543 = vmatmul.bf16.gmra.mxu1 %v1688_v17 }
  0x56   :  { %583 = vmatmul.bf16.gmra.mxu2 %v1696_v22  ;;  %623 = vmatmul.bf16.gmra.mxu3 %v1704_v32 }
  0x65   :  { %508 = vmatmul.bf16.gmra.mxu0 %v1681_v20  ;;  %548 = vmatmul.bf16.gmra.mxu1 %v1689_v21 }
  0x66   :  { %588 = vmatmul.bf16.gmra.mxu2 %v1697_v26  ;;  %628 = vmatmul.bf16.gmra.mxu3 %v1705_v36  ;;  %v130_v26 = vld [vmem:[#allocation2 + $0x110] sm:$0xff] }
  0x75   :  { %513 = vmatmul.bf16.gmra.mxu0 %v1682_v24  ;;  %553 = vmatmul.bf16.gmra.mxu1 %v1690_v25  ;;  %v103_v24 = vld [vmem:[#allocation2 + $0x38] sm:$0xff]  ;;  %v118_v25 = vld [vmem:[#allocation2 + $0xb0] sm:$0xff] }
  0x76   :  { %593 = vmatmul.bf16.gmra.mxu2 %v1698_v31  ;;  %633 = vmatmul.bf16.gmra.mxu3 %v1706_v44  ;;  %v119_v31 = vld [vmem:[#allocation2 + $0xb8] sm:$0xff]  ;;  %v120_v44 = vld [vmem:[#allocation2 + $0xc0] sm:$0xff] }
  0x85   :  { %518 = vmatmul.bf16.gmra.mxu0 %v1683_v29  ;;  %558 = vmatmul.bf16.gmra.mxu1 %v1691_v30 }
  0x86   :  { %598 = vmatmul.bf16.gmra.mxu2 %v1699_v35  ;;  %638 = vmatmul.bf16.gmra.mxu3 %v1707_v63 }
  0x95   :  { %523 = vmatmul.bf16.gmra.mxu0 %v1684_v33  ;;  %563 = vmatmul.bf16.gmra.mxu1 %v1692_v34  ;;  %v131_v33 = vld [vmem:[#allocation2 + $0x118] sm:$0xff] }
  0x96   :  { %603 = vmatmul.bf16.gmra.mxu2 %v1700_v43  ;;  %643 = vmatmul.bf16.gmra.mxu3 %v1708_v18  ;;  %v105_v43 = vld [vmem:[#allocation2 + $0x48] sm:$0xff]  ;;  %v147_v18 = vld [vmem:[#allocation2 + $0x198] sm:$0xff] }
  0xa2   :  { %v489_v38 = vpop.f32.mrf.mxu0  ;;  %v529_v40 = vpop.f32.mrf.mxu1 }
  0xa3   :  { %v649_v39 = vadd.f32 %v489_v38, %v96_v37  ;;  %v665_v53 = vadd.f32 %v529_v40, %v112_v48  ;;  %v104_v37 = vld [vmem:[#allocation2 + $0x40] sm:$0xff] }
  0xa5   :  { %714 = vst.msk [vmem:[#allocation2] sm:$0xff] %vm31_vm0, %v649_v39 }
  0xa6   :  { %730 = vst.msk [vmem:[#allocation2 + $0x80] sm:$0xff] %vm31_vm0, %v665_v53 }
  0xa9   :  { %v569_v4 = vpop.f32.mrf.mxu2 }
  0xaa   :  { %v491_v41 = vpop.f32.mrf.mxu0  ;;  %v531_v42 = vpop.f32.mrf.mxu1  ;;  %v681_v9 = vadd.f32 %v569_v4, %v128_v7  ;;  %v122_v4 = vld [vmem:[#allocation2 + $0xd0] sm:$0xff] }
  0xab   :  { %v650_v49 = vadd.f32 %v491_v41, %v97_v45  ;;  %v666_v54 = vadd.f32 %v531_v42, %v113_v50  ;;  %v609_v42 = vpop.f32.mrf.mxu3  ;;  %v132_v45 = vld [vmem:[#allocation2 + $0x120] sm:$0xff]  ;;  %v146_v7 = vld [vmem:[#allocation2 + $0x190] sm:$0xff] }
  0xac   :  { %746 = vst.msk [vmem:[#allocation2 + $0x100] sm:$0xff] %vm31_vm0, %v681_v9 }
  0xad   :  { %715 = vst.msk [vmem:[#allocation2 + $0x8] sm:$0xff] %vm31_vm0, %v650_v49 }
  0xae   :  { %731 = vst.msk [vmem:[#allocation2 + $0x88] sm:$0xff] %vm31_vm0, %v666_v54  ;;  %v133_v54 = vld [vmem:[#allocation2 + $0x128] sm:$0xff] }
  0xb1   :  { %v571_v15 = vpop.f32.mrf.mxu2 }
  0xb2   :  { %v494_v47 = vpop.f32.mrf.mxu0  ;;  %v534_v52 = vpop.f32.mrf.mxu1  ;;  %v682_v17 = vadd.f32 %v571_v15, %v129_v14  ;;  %v135_v14 = vld [vmem:[#allocation2 + $0x138] sm:$0xff] }
  0xb3   :  { %v651_v51 = vadd.f32 %v494_v47, %v98_v46  ;;  %v667_v57 = vadd.f32 %v534_v52, %v114_v56  ;;  %v144_v46 = vld [vmem:[#allocation2 + $0x180] sm:$0xff]  ;;  %v121_v52 = vld [vmem:[#allocation2 + $0xc8] sm:$0xff] }
  0xb4   :  { %747 = vst.msk [vmem:[#allocation2 + $0x108] sm:$0xff] %vm31_vm0, %v682_v17  ;;  %v697_v50 = vadd.f32 %v609_v42, %v144_v46 }
  0xb5   :  { %716 = vst.msk [vmem:[#allocation2 + $0x10] sm:$0xff] %vm31_vm0, %v651_v51 }
  0xb6   :  { %732 = vst.msk [vmem:[#allocation2 + $0x90] sm:$0xff] %vm31_vm0, %v667_v57 }
  0xb7   :  { %762 = vst.msk [vmem:[#allocation2 + $0x180] sm:$0xff] %vm31_vm0, %v697_v50 }
  0xb9   :  { %v574_v23 = vpop.f32.mrf.mxu2 }
  0xba   :  { %v496_v58 = vpop.f32.mrf.mxu0  ;;  %v536_v61 = vpop.f32.mrf.mxu1  ;;  %v683_v28 = vadd.f32 %v574_v23, %v130_v26  ;;  %v781_v23 = vld [vmem:[#allocation2] sm:$0xff] }
  0xbb   :  { %v652_v59 = vadd.f32 %v496_v58, %v99_v55  ;;  %v668_v62 = vadd.f32 %v536_v61, %v115_v60  ;;  %v145_v58 = vld [vmem:[#allocation2 + $0x188] sm:$0xff]  ;;  %v106_v61 = vld [vmem:[#allocation2 + $0x50] sm:$0xff] }
  0xbc   :  { %748 = vst.msk [vmem:[#allocation2 + $0x110] sm:$0xff] %vm31_vm0, %v683_v28 }
  0xbd   :  { %717 = vst.msk [vmem:[#allocation2 + $0x18] sm:$0xff] %vm31_vm0, %v652_v59  ;;  %v611_v59 = vpop.f32.mrf.mxu3 }
  0xbe   :  { %733 = vst.msk [vmem:[#allocation2 + $0x98] sm:$0xff] %vm31_vm0, %v668_v62  ;;  %v698_v60 = vadd.f32 %v611_v59, %v145_v58  ;;  %v136_v58 = vld [vmem:[#allocation2 + $0x140] sm:$0xff] }
  0xc0   :  { %763 = vst.msk [vmem:[#allocation2 + $0x188] sm:$0xff] %vm31_vm0, %v698_v60 }
  0xc1   :  { %v576_v34 = vpop.f32.mrf.mxu2 }
  0xc2   :  { %v499_v1 = vpop.f32.mrf.mxu0  ;;  %v539_v3 = vpop.f32.mrf.mxu1  ;;  %v684_v36 = vadd.f32 %v576_v34, %v131_v33 }
  0xc3   :  { %v653_v2 = vadd.f32 %v499_v1, %v100_v0  ;;  %v669_v8 = vadd.f32 %v539_v3, %v116_v6  ;;  %v107_v3 = vld [vmem:[#allocation2 + $0x58] sm:$0xff] }
  0xc4   :  { %749 = vst.msk [vmem:[#allocation2 + $0x118] sm:$0xff] %vm31_vm0, %v684_v36  ;;  %v784_v28 = vld [vmem:[#allocation2 + $0x18] sm:$0xff] }
  0xc5   :  { %718 = vst.msk [vmem:[#allocation2 + $0x20] sm:$0xff] %vm31_vm0, %v653_v2  ;;  %v614_v2 = vpop.f32.mrf.mxu3 }
  0xc6   :  { %734 = vst.msk [vmem:[#allocation2 + $0xa0] sm:$0xff] %vm31_vm0, %v669_v8 }
  0xc9   :  { %v579_v41 = vpop.f32.mrf.mxu2 }
  0xca   :  { %v501_v10 = vpop.f32.mrf.mxu0  ;;  %v541_v13 = vpop.f32.mrf.mxu1  ;;  %v685_v48 = vadd.f32 %v579_v41, %v132_v45 }
  0xcb   :  { %v654_v11 = vadd.f32 %v501_v10, %v101_v5  ;;  %v670_v16 = vadd.f32 %v541_v13, %v117_v12  ;;  %v134_v5 = vld [vmem:[#allocation2 + $0x130] sm:$0xff]  ;;  %v699_v10 = vadd.f32 %v614_v2, %v146_v7  ;;  %v123_v12 = vld [vmem:[#allocation2 + $0xd8] sm:$0xff]  ;;  %v125_v2 = vld [vmem:[#allocation2 + $0xe8] sm:$0xff] }
  0xcc   :  { %750 = vst.msk [vmem:[#allocation2 + $0x120] sm:$0xff] %vm31_vm0, %v685_v48  ;;  %v785_v34 = vld [vmem:[#allocation2 + $0x20] sm:$0xff] }
  0xcd   :  { %719 = vst.msk [vmem:[#allocation2 + $0x28] sm:$0xff] %vm31_vm0, %v654_v11 }
  0xce   :  { %735 = vst.msk [vmem:[#allocation2 + $0xa8] sm:$0xff] %vm31_vm0, %v670_v16 }
  0xcf   :  { %764 = vst.msk [vmem:[#allocation2 + $0x190] sm:$0xff] %vm31_vm0, %v699_v10  ;;  %v149_v10 = vld [vmem:[#allocation2 + $0x1a8] sm:$0xff] }
  0xd1   :  { %v581_v55 = vpop.f32.mrf.mxu2 }
  0xd2   :  { %v504_v20 = vpop.f32.mrf.mxu0  ;;  %v544_v22 = vpop.f32.mrf.mxu1  ;;  %v686_v57 = vadd.f32 %v581_v55, %v133_v54  ;;  %v852_v55 = vsel %vm31_vm0, %v785_v34, 0.0 }
  0xd3   :  { %v655_v21 = vadd.f32 %v504_v20, %v102_v19  ;;  %v671_v27 = vadd.f32 %v544_v22, %v118_v25  ;;  %v616_v19 = vpop.f32.mrf.mxu3  ;;  %v108_v22 = vld [vmem:[#allocation2 + $0x60] sm:$0xff] }
  0xd4   :  { %751 = vst.msk [vmem:[#allocation2 + $0x128] sm:$0xff] %vm31_vm0, %v686_v57  ;;  %v700_v20 = vadd.f32 %v616_v19, %v147_v18  ;;  %v124_v57 = vld [vmem:[#allocation2 + $0xe0] sm:$0xff]  ;;  %v110_v18 = vld [vmem:[#allocation2 + $0x70] sm:$0xff] }
  0xd5   :  { %720 = vst.msk [vmem:[#allocation2 + $0x30] sm:$0xff] %vm31_vm0, %v655_v21  ;;  %v782_v21 = vld [vmem:[#allocation2 + $0x8] sm:$0xff] }
  0xd6   :  { %736 = vst.msk [vmem:[#allocation2 + $0xb0] sm:$0xff] %vm31_vm0, %v671_v27  ;;  %v979_v26 = vmul.f32 %v782_v21, %v782_v21 }
  0xd7   :  { %765 = vst.msk [vmem:[#allocation2 + $0x198] sm:$0xff] %vm31_vm0, %v700_v20 }
  0xd8   :  { %v1043_v36 = vsel %vm31_vm0, %v979_v26, 0.0 }
  0xd9   :  { %v584_v1 = vpop.f32.mrf.mxu2 }
  0xda   :  { %v506_v29 = vpop.f32.mrf.mxu0  ;;  %v546_v32 = vpop.f32.mrf.mxu1  ;;  %v687_v9 = vadd.f32 %v584_v1, %v134_v5  ;;  %v148_v1 = vld [vmem:[#allocation2 + $0x1a0] sm:$0xff] }
  0xdb   :  { %v656_v30 = vadd.f32 %v506_v29, %v103_v24  ;;  %v672_v35 = vadd.f32 %v546_v32, %v119_v31  ;;  %v783_v24 = vld [vmem:[#allocation2 + $0x10] sm:$0xff]  ;;  %v978_v31 = vmul.f32 %v781_v23, %v781_v23  ;;  %v619_v33 = vpop.f32.mrf.mxu3 }
  0xdc   :  { %752 = vst.msk [vmem:[#allocation2 + $0x130] sm:$0xff] %vm31_vm0, %v687_v9  ;;  %v980_v32 = vmul.f32 %v783_v24, %v783_v24  ;;  %v848_v42 = vsel %vm31_vm0, %v783_v24, 0.0 }
  0xdd   :  { %721 = vst.msk [vmem:[#allocation2 + $0x38] sm:$0xff] %vm31_vm0, %v656_v30  ;;  %v1042_v41 = vsel %vm31_vm0, %v978_v31, 0.0 }
  0xde   :  { %737 = vst.msk [vmem:[#allocation2 + $0xb8] sm:$0xff] %vm31_vm0, %v672_v35  ;;  %v846_v35 = vsel %vm31_vm0, %v782_v21, 0.0  ;;  %v1044_v46 = vadd.f32 %v1043_v36, %v1042_v41 }
  0xe1   :  { %v586_v15 = vpop.f32.mrf.mxu2 }
  0xe2   :  { %v509_v38 = vpop.f32.mrf.mxu0  ;;  %v549_v40 = vpop.f32.mrf.mxu1  ;;  %v688_v17 = vadd.f32 %v586_v15, %v135_v14 }
  0xe3   :  { %v657_v39 = vadd.f32 %v509_v38, %v104_v37  ;;  %v673_v47 = vadd.f32 %v549_v40, %v120_v44  ;;  %v981_v37 = vmul.f32 %v784_v28, %v784_v28  ;;  %v845_v38 = vsel %vm31_vm0, %v781_v23, 0.0  ;;  %v109_v40 = vld [vmem:[#allocation2 + $0x68] sm:$0xff] }
  0xe4   :  { %753 = vst.msk [vmem:[#allocation2 + $0x138] sm:$0xff] %vm31_vm0, %v688_v17  ;;  %v982_v44 = vmul.f32 %v785_v34, %v785_v34  ;;  %v847_v45 = vadd.f32 %v846_v35, %v845_v38 }
  0xe5   :  { %722 = vst.msk [vmem:[#allocation2 + $0x40] sm:$0xff] %vm31_vm0, %v657_v39  ;;  %v786_v39 = vld [vmem:[#allocation2 + $0x28] sm:$0xff]  ;;  %v1047_v50 = vsel %vm31_vm0, %v981_v37, 0.0 }
  0xe6   :  { %738 = vst.msk [vmem:[#allocation2 + $0xc0] sm:$0xff] %vm31_vm0, %v673_v47  ;;  %v1996_v47 = vld [vmem:[#allocation2 + $0x30] sm:$0xff] }
  0xe7   :  { %v856_v20 = vsel %vm31_vm0, %v1996_v47, 0.0 }
  0xe9   :  { %v589_v30 = vpop.f32.mrf.mxu2 }
  0xea   :  { %v511_v49 = vpop.f32.mrf.mxu0  ;;  %v551_v53 = vpop.f32.mrf.mxu1 }
  0xeb   :  { %v658_v51 = vadd.f32 %v511_v49, %v105_v43  ;;  %v674_v56 = vadd.f32 %v551_v53, %v121_v52  ;;  %v1045_v43 = vsel %vm31_vm0, %v980_v32, 0.0  ;;  %v850_v49 = vsel %vm31_vm0, %v784_v28, 0.0 }
  0xec   :  { %v849_v53 = vadd.f32 %v848_v42, %v847_v45  ;;  %v1046_v54 = vadd.f32 %v1045_v43, %v1044_v46  ;;  %v2007_v7 = vld [vmem:[#allocation2 + $0x40] sm:$0xff] }
  0xed   :  { %723 = vst.msk [vmem:[#allocation2 + $0x48] sm:$0xff] %vm31_vm0, %v658_v51  ;;  %v983_v51 = vmul.f32 %v786_v39, %v786_v39  ;;  %v860_v35 = vsel %vm31_vm0, %v2007_v7, 0.0 }
  0xee   :  { %739 = vst.msk [vmem:[#allocation2 + $0xc8] sm:$0xff] %vm31_vm0, %v674_v56  ;;  %v2001_v56 = vld [vmem:[#allocation2 + $0x38] sm:$0xff]  ;;  %v851_v5 = vadd.f32 %v850_v49, %v849_v53 }
  0xf0   :  { %v853_v15 = vadd.f32 %v852_v55, %v851_v5 }
  0xf1   :  { %v591_v60 = vpop.f32.mrf.mxu2 }
  0xf2   :  { %v514_v62 = vpop.f32.mrf.mxu0  ;;  %v554_v0 = vpop.f32.mrf.mxu1 }
  0xf3   :  { %v659_v63 = vadd.f32 %v514_v62, %v106_v61  ;;  %v675_v6 = vadd.f32 %v554_v0, %v122_v4  ;;  %v1049_v61 = vsel %vm31_vm0, %v982_v44, 0.0  ;;  %v984_v62 = vmul.f32 %v1996_v47, %v1996_v47  ;;  %v621_v4 = vpop.f32.mrf.mxu3 }
  0xf4   :  { %v689_v0 = vadd.f32 %v589_v30, %v136_v58  ;;  %v2014_v17 = vld [vmem:[#allocation2 + $0x48] sm:$0xff]  ;;  %v702_v19 = vadd.f32 %v621_v4, %v149_v10  ;;  %v139_v10 = vld [vmem:[#allocation2 + $0x158] sm:$0xff] }
  0xf5   :  { %724 = vst.msk [vmem:[#allocation2 + $0x50] sm:$0xff] %vm31_vm0, %v659_v63  ;;  %v1053_v21 = vsel %vm31_vm0, %v984_v62, 0.0  ;;  %v862_v42 = vsel %vm31_vm0, %v2014_v17, 0.0 }
  0xf6   :  { %740 = vst.msk [vmem:[#allocation2 + $0xd0] sm:$0xff] %vm31_vm0, %v675_v6  ;;  %v1048_v6 = vadd.f32 %v1047_v50, %v1046_v54 }
  0xf7   :  { %754 = vst.msk [vmem:[#allocation2 + $0x140] sm:$0xff] %vm31_vm0, %v689_v0  ;;  %v138_v0 = vld [vmem:[#allocation2 + $0x150] sm:$0xff] }
  0xf8   :  { %767 = vst.msk [vmem:[#allocation2 + $0x1a8] sm:$0xff] %vm31_vm0, %v702_v19 }
  0xf9   :  { %v594_v34 = vpop.f32.mrf.mxu2 }
  0xfa   :  { %v516_v8 = vpop.f32.mrf.mxu0  ;;  %v556_v13 = vpop.f32.mrf.mxu1 }
  0xfb   :  { %v660_v11 = vadd.f32 %v516_v8, %v107_v3  ;;  %v676_v16 = vadd.f32 %v556_v13, %v123_v12  ;;  %v137_v3 = vld [vmem:[#allocation2 + $0x148] sm:$0xff]  ;;  %v701_v8 = vadd.f32 %v619_v33, %v148_v1  ;;  %v1051_v12 = vsel %vm31_vm0, %v983_v51, 0.0  ;;  %v624_v38 = vpop.f32.mrf.mxu3 }
  0xfc   :  { %v985_v13 = vmul.f32 %v2001_v56, %v2001_v56  ;;  %v690_v14 = vadd.f32 %v591_v60, %v137_v3 }
  0xfd   :  { %725 = vst.msk [vmem:[#allocation2 + $0x58] sm:$0xff] %vm31_vm0, %v660_v11  ;;  %v854_v11 = vsel %vm31_vm0, %v786_v39, 0.0 }
  0xfe   :  { %741 = vst.msk [vmem:[#allocation2 + $0xd8] sm:$0xff] %vm31_vm0, %v676_v16  ;;  %v1050_v16 = vadd.f32 %v1049_v61, %v1048_v6  ;;  %v855_v23 = vadd.f32 %v854_v11, %v853_v15  ;;  %v1055_v28 = vsel %vm31_vm0, %v985_v13, 0.0 }
  0xff   :  { %766 = vst.msk [vmem:[#allocation2 + $0x1a0] sm:$0xff] %vm31_vm0, %v701_v8  ;;  %v150_v8 = vld [vmem:[#allocation2 + $0x1b0] sm:$0xff] }
 0x100   :  { %v1052_v24 = vadd.f32 %v1051_v12, %v1050_v16  ;;  %755 = vst.msk [vmem:[#allocation2 + $0x148] sm:$0xff] %vm31_vm0, %v690_v14  ;;  %v857_v31 = vadd.f32 %v856_v20, %v855_v23  ;;  %v691_v14 = vadd.f32 %v594_v34, %v138_v0  ;;  %v703_v15 = vadd.f32 %v624_v38, %v150_v8  ;;  %v151_v16 = vld [vmem:[#allocation2 + $0x1b8] sm:$0xff]  ;;  %v2088_v38 = vld [vmem:[#allocation2 + $0x90] sm:$0xff]  ;;  %v141_v8 = vld [vmem:[#allocation2 + $0x168] sm:$0xff] }
 0x102   :  { %v519_v25 = vpop.f32.mrf.mxu0  ;;  %v559_v29 = vpop.f32.mrf.mxu1  ;;  %v1054_v32 = vadd.f32 %v1053_v21, %v1052_v24  ;;  %756 = vst.msk [vmem:[#allocation2 + $0x150] sm:$0xff] %vm31_vm0, %v691_v14  ;;  %v153_v14 = vld [vmem:[#allocation2 + $0x1c8] sm:$0xff] }
 0x103   :  { %v661_v27 = vadd.f32 %v519_v25, %v108_v22  ;;  %v677_v63 = vadd.f32 %v559_v29, %v124_v57  ;;  %v986_v22 = vmul.f32 %v2007_v7, %v2007_v7  ;;  %v2023_v25 = vld [vmem:[#allocation2 + $0x50] sm:$0xff]  ;;  %v987_v29 = vmul.f32 %v2014_v17, %v2014_v17  ;;  %v626_v11 = vpop.f32.mrf.mxu3  ;;  %768 = vst.msk [vmem:[#allocation2 + $0x1b0] sm:$0xff] %vm31_vm0, %v703_v15 }
 0x104   :  { %v988_v37 = vmul.f32 %v2023_v25, %v2023_v25  ;;  %v2039_v41 = vld [vmem:[#allocation2 + $0x58] sm:$0xff]  ;;  %v864_v49 = vsel %vm31_vm0, %v2023_v25, 0.0  ;;  %v704_v24 = vadd.f32 %v626_v11, %v151_v16  ;;  %v2120_v16 = vld [vmem:[#allocation2 + $0xb0] sm:$0xff] }
 0x105   :  { %726 = vst.msk [vmem:[#allocation2 + $0x60] sm:$0xff] %vm31_vm0, %v661_v27  ;;  %v858_v27 = vsel %vm31_vm0, %v2001_v56, 0.0  ;;  %v1057_v36 = vsel %vm31_vm0, %v986_v22, 0.0  ;;  %v1059_v43 = vsel %vm31_vm0, %v987_v29, 0.0  ;;  %v989_v51 = vmul.f32 %v2039_v41, %v2039_v41 }
 0x106   :  { %742 = vst.msk [vmem:[#allocation2 + $0xe0] sm:$0xff] %vm31_vm0, %v677_v63  ;;  %v859_v39 = vadd.f32 %v858_v27, %v857_v31  ;;  %v1061_v50 = vsel %vm31_vm0, %v988_v37, 0.0  ;;  %v866_v58 = vsel %vm31_vm0, %v2039_v41, 0.0  ;;  %v126_v63 = vld [vmem:[#allocation2 + $0xf0] sm:$0xff] }
 0x107   :  { %v1063_v3 = vsel %vm31_vm0, %v989_v51, 0.0  ;;  %769 = vst.msk [vmem:[#allocation2 + $0x1b8] sm:$0xff] %vm31_vm0, %v704_v24  ;;  %v2101_v51 = vld [vmem:[#allocation2 + $0x98] sm:$0xff] }
 0x108   :  { %v861_v45 = vadd.f32 %v860_v35, %v859_v39  ;;  %v997_v0 = vmul.f32 %v2101_v51, %v2101_v51 }
 0x10a   :  { %v521_v48 = vpop.f32.mrf.mxu0  ;;  %v561_v59 = vpop.f32.mrf.mxu1 }
 0x10b   :  { %v662_v52 = vadd.f32 %v521_v48, %v109_v40  ;;  %v678_v9 = vadd.f32 %v561_v59, %v125_v2  ;;  %v1056_v40 = vadd.f32 %v1055_v28, %v1054_v32  ;;  %v111_v48 = vld [vmem:[#allocation2 + $0x78] sm:$0xff]  ;;  %v596_v2 = vpop.f32.mrf.mxu2  ;;  %v2076_v28 = vld [vmem:[#allocation2 + $0x80] sm:$0xff]  ;;  %v2081_v32 = vld [vmem:[#allocation2 + $0x88] sm:$0xff] }
 0x10c   :  { %v2044_v44 = vld [vmem:[#allocation2 + $0x60] sm:$0xff]  ;;  %v692_v21 = vadd.f32 %v596_v2, %v139_v10  ;;  %v994_v37 = vmul.f32 %v2076_v28, %v2076_v28  ;;  %v882_v10 = vsel %vm31_vm0, %v2101_v51, 0.0 }
 0x10d   :  { %727 = vst.msk [vmem:[#allocation2 + $0x68] sm:$0xff] %vm31_vm0, %v662_v52  ;;  %v1058_v46 = vadd.f32 %v1057_v36, %v1056_v40  ;;  %v863_v52 = vadd.f32 %v862_v42, %v861_v45  ;;  %v990_v54 = vmul.f32 %v2044_v44, %v2044_v44  ;;  %v868_v4 = vsel %vm31_vm0, %v2044_v44, 0.0  ;;  %v629_v42 = vpop.f32.mrf.mxu3 }
 0x10e   :  { %743 = vst.msk [vmem:[#allocation2 + $0xe8] sm:$0xff] %vm31_vm0, %v678_v9  ;;  %v127_v9 = vld [vmem:[#allocation2 + $0xf8] sm:$0xff] }
 0x10f   :  { %v1060_v53 = vadd.f32 %v1059_v43, %v1058_v46  ;;  %v865_v60 = vadd.f32 %v864_v49, %v863_v52  ;;  %v1065_v13 = vsel %vm31_vm0, %v990_v54, 0.0  ;;  %757 = vst.msk [vmem:[#allocation2 + $0x158] sm:$0xff] %vm31_vm0, %v692_v21  ;;  %v876_v46 = vsel %vm31_vm0, %v2076_v28, 0.0 }
 0x110   :  { %v1073_v54 = vsel %vm31_vm0, %v994_v37, 0.0  ;;  %v1079_v21 = vsel %vm31_vm0, %v997_v0, 0.0 }
 0x111   :  { %v1062_v61 = vadd.f32 %v1061_v50, %v1060_v53  ;;  %v867_v12 = vadd.f32 %v866_v58, %v865_v60  ;;  %v996_v50 = vmul.f32 %v2088_v38, %v2088_v38  ;;  %v2106_v58 = vld [vmem:[#allocation2 + $0xa0] sm:$0xff] }
 0x112   :  { %v524_v26 = vpop.f32.mrf.mxu0  ;;  %v564_v33 = vpop.f32.mrf.mxu1  ;;  %v998_v11 = vmul.f32 %v2106_v58, %v2106_v58 }
 0x113   :  { %v663_v30 = vadd.f32 %v524_v26, %v110_v18  ;;  %v679_v6 = vadd.f32 %v564_v33, %v126_v63  ;;  %v1064_v22 = vadd.f32 %v1063_v3, %v1062_v61  ;;  %v869_v23 = vadd.f32 %v868_v4, %v867_v12  ;;  %v599_v36 = vpop.f32.mrf.mxu2 }
 0x114   :  { %v2053_v55 = vld [vmem:[#allocation2 + $0x68] sm:$0xff]  ;;  %v880_v63 = vsel %vm31_vm0, %v2088_v38, 0.0  ;;  %v1077_v2 = vsel %vm31_vm0, %v996_v50, 0.0 }
 0x115   :  { %728 = vst.msk [vmem:[#allocation2 + $0x70] sm:$0xff] %vm31_vm0, %v663_v30  ;;  %v991_v5 = vmul.f32 %v2053_v55, %v2053_v55  ;;  %v870_v18 = vsel %vm31_vm0, %v2053_v55, 0.0  ;;  %v1066_v29 = vadd.f32 %v1065_v13, %v1064_v22  ;;  %v631_v15 = vpop.f32.mrf.mxu3  ;;  %v884_v22 = vsel %vm31_vm0, %v2106_v58, 0.0 }
 0x116   :  { %744 = vst.msk [vmem:[#allocation2 + $0xf0] sm:$0xff] %vm31_vm0, %v679_v6  ;;  %v871_v30 = vadd.f32 %v870_v18, %v869_v23  ;;  %v152_v6 = vld [vmem:[#allocation2 + $0x1c0] sm:$0xff]  ;;  %v706_v24 = vadd.f32 %v631_v15, %v153_v14  ;;  %v2173_v14 = vld [vmem:[#allocation2 + $0xe8] sm:$0xff] }
 0x117   :  { %v1067_v26 = vsel %vm31_vm0, %v991_v5, 0.0  ;;  %v140_v5 = vld [vmem:[#allocation2 + $0x160] sm:$0xff]  ;;  %v705_v13 = vadd.f32 %v629_v42, %v152_v6 }
 0x118   :  { %v1068_v33 = vadd.f32 %v1067_v26, %v1066_v29  ;;  %v693_v12 = vadd.f32 %v599_v36, %v140_v5  ;;  %v2128_v26 = vld [vmem:[#allocation2 + $0xb8] sm:$0xff]  ;;  %771 = vst.msk [vmem:[#allocation2 + $0x1c8] sm:$0xff] %vm31_vm0, %v706_v24 }
 0x119   :  { %770 = vst.msk [vmem:[#allocation2 + $0x1c0] sm:$0xff] %vm31_vm0, %v705_v13  ;;  %v1001_v42 = vmul.f32 %v2128_v26, %v2128_v26  ;;  %v890_v50 = vsel %vm31_vm0, %v2128_v26, 0.0 }
 0x11a   :  { %v526_v57 = vpop.f32.mrf.mxu0  ;;  %v566_v1 = vpop.f32.mrf.mxu1  ;;  %758 = vst.msk [vmem:[#allocation2 + $0x160] sm:$0xff] %vm31_vm0, %v693_v12 }
 0x11b   :  { %v664_v59 = vadd.f32 %v526_v57, %v111_v48  ;;  %v680_v20 = vadd.f32 %v566_v1, %v127_v9  ;;  %v995_v48 = vmul.f32 %v2081_v32, %v2081_v32  ;;  %v878_v57 = vsel %vm31_vm0, %v2081_v32, 0.0  ;;  %v2113_v1 = vld [vmem:[#allocation2 + $0xa8] sm:$0xff]  ;;  %v601_v9 = vpop.f32.mrf.mxu2 }
 0x11c   :  { %v2057_v62 = vld [vmem:[#allocation2 + $0x70] sm:$0xff]  ;;  %v999_v23 = vmul.f32 %v2113_v1, %v2113_v1 }
 0x11d   :  { %729 = vst.msk [vmem:[#allocation2 + $0x78] sm:$0xff] %vm31_vm0, %v664_v59  ;;  %v992_v19 = vmul.f32 %v2057_v62, %v2057_v62  ;;  %v872_v27 = vsel %vm31_vm0, %v2057_v62, 0.0  ;;  %v1075_v61 = vsel %vm31_vm0, %v995_v48, 0.0 }
 0x11e   :  { %745 = vst.msk [vmem:[#allocation2 + $0xf8] sm:$0xff] %vm31_vm0, %v680_v20  ;;  %v873_v34 = vadd.f32 %v872_v27, %v871_v30  ;;  %v694_v20 = vadd.f32 %v601_v9, %v141_v8  ;;  %v1081_v30 = vsel %vm31_vm0, %v998_v11, 0.0  ;;  %v2166_v8 = vld [vmem:[#allocation2 + $0xe0] sm:$0xff] }
 0x11f   :  { %v1069_v31 = vsel %vm31_vm0, %v992_v19, 0.0 }
 0x120   :  { %v1070_v43 = vadd.f32 %v1069_v31, %v1068_v33  ;;  %v886_v31 = vsel %vm31_vm0, %v2113_v1, 0.0  ;;  %v1000_v33 = vmul.f32 %v2120_v16, %v2120_v16  ;;  %759 = vst.msk [vmem:[#allocation2 + $0x168] sm:$0xff] %vm31_vm0, %v694_v20 }
 0x123   :  { %v604_v48 = vpop.f32.mrf.mxu2 }
 0x124   :  { %v2083_v35 = vld [vmem:[#allocation2 + $0x78] sm:$0xff] }
 0x125   :  { %v874_v39 = vsel %vm31_vm0, %v2083_v35, 0.0  ;;  %v993_v40 = vmul.f32 %v2083_v35, %v2083_v35 }
 0x126   :  { %v875_v45 = vadd.f32 %v874_v39, %v873_v34  ;;  %v2137_v34 = vld [vmem:[#allocation2 + $0xc0] sm:$0xff]  ;;  %v1083_v39 = vsel %vm31_vm0, %v999_v23, 0.0  ;;  %v143_v23 = vld [vmem:[#allocation2 + $0x178] sm:$0xff] }
 0x127   :  { %v1071_v49 = vsel %vm31_vm0, %v993_v40, 0.0  ;;  %v888_v40 = vsel %vm31_vm0, %v2120_v16, 0.0 }
 0x128   :  { %v877_v52 = vadd.f32 %v876_v46, %v875_v45  ;;  %v1072_v53 = vadd.f32 %v1071_v49, %v1070_v43  ;;  %v2145_v43 = vld [vmem:[#allocation2 + $0xc8] sm:$0xff]  ;;  %v1085_v49 = vsel %vm31_vm0, %v1000_v33, 0.0  ;;  %v155_v33 = vld [vmem:[#allocation2 + $0x1d8] sm:$0xff] }
 0x129   :  { %v894_v6 = vsel %vm31_vm0, %v2145_v43, 0.0 }
 0x12a   :  { %v879_v59 = vadd.f32 %v878_v57, %v877_v52  ;;  %v1074_v60 = vadd.f32 %v1073_v54, %v1072_v53  ;;  %v1002_v52 = vmul.f32 %v2137_v34, %v2137_v34  ;;  %v2152_v53 = vld [vmem:[#allocation2 + $0xd0] sm:$0xff]  ;;  %v634_v54 = vpop.f32.mrf.mxu3 }
 0x12b   :  { %v1004_v0 = vmul.f32 %v2152_v53, %v2152_v53  ;;  %v896_v12 = vsel %vm31_vm0, %v2152_v53, 0.0  ;;  %v606_v24 = vpop.f32.mrf.mxu2 }
 0x12c   :  { %v881_v3 = vadd.f32 %v880_v63, %v879_v59  ;;  %v1076_v4 = vadd.f32 %v1075_v61, %v1074_v60  ;;  %v1087_v60 = vsel %vm31_vm0, %v1001_v42, 0.0  ;;  %v892_v61 = vsel %vm31_vm0, %v2137_v34, 0.0 }
 0x12d   :  { %v1003_v63 = vmul.f32 %v2145_v43, %v2145_v43  ;;  %v1089_v5 = vsel %vm31_vm0, %v1002_v52, 0.0  ;;  %v1093_v15 = vsel %vm31_vm0, %v1004_v0, 0.0  ;;  %v2188_v52 = vld [vmem:[#allocation2 + $0xf8] sm:$0xff] }
 0x12e   :  { %v883_v18 = vadd.f32 %v882_v10, %v881_v3  ;;  %v1078_v19 = vadd.f32 %v1077_v2, %v1076_v4  ;;  %v2161_v2 = vld [vmem:[#allocation2 + $0xd8] sm:$0xff] }
 0x12f   :  { %v1091_v11 = vsel %vm31_vm0, %v1003_v63, 0.0  ;;  %v1005_v13 = vmul.f32 %v2161_v2, %v2161_v2 }
 0x130   :  { %v885_v27 = vadd.f32 %v884_v22, %v883_v18  ;;  %v1080_v29 = vadd.f32 %v1079_v21, %v1078_v19  ;;  %v898_v18 = vsel %vm31_vm0, %v2161_v2, 0.0  ;;  %v142_v21 = vld [vmem:[#allocation2 + $0x170] sm:$0xff] }
 0x131   :  { %v154_v22 = vld [vmem:[#allocation2 + $0x1d0] sm:$0xff] }
 0x132   :  { %v887_v36 = vadd.f32 %v886_v31, %v885_v27  ;;  %v1082_v37 = vadd.f32 %v1081_v30, %v1080_v29  ;;  %v1006_v27 = vmul.f32 %v2166_v8, %v2166_v8  ;;  %v695_v29 = vadd.f32 %v604_v48, %v142_v21 }
 0x133   :  { %v707_v30 = vadd.f32 %v634_v54, %v154_v22  ;;  %v696_v31 = vadd.f32 %v606_v24, %v143_v23  ;;  %v2219_v23 = vld [vmem:[#allocation2 + $0x118] sm:$0xff] }
 0x134   :  { %v1084_v45 = vadd.f32 %v1083_v39, %v1082_v37  ;;  %v889_v46 = vadd.f32 %v888_v40, %v887_v36  ;;  %v636_v36 = vpop.f32.mrf.mxu3  ;;  %v2180_v40 = vld [vmem:[#allocation2 + $0xf0] sm:$0xff]  ;;  %760 = vst.msk [vmem:[#allocation2 + $0x170] sm:$0xff] %vm31_vm0, %v695_v29  ;;  %v1097_v54 = vsel %vm31_vm0, %v1006_v27, 0.0 }
 0x135   :  { %v708_v42 = vadd.f32 %v636_v36, %v155_v33  ;;  %772 = vst.msk [vmem:[#allocation2 + $0x1d0] sm:$0xff] %vm31_vm0, %v707_v30  ;;  %v2226_v33 = vld [vmem:[#allocation2 + $0x120] sm:$0xff] }
 0x136   :  { %v891_v57 = vadd.f32 %v890_v50, %v889_v46  ;;  %v1086_v59 = vadd.f32 %v1085_v49, %v1084_v45  ;;  %v1095_v45 = vsel %vm31_vm0, %v1005_v13, 0.0  ;;  %v900_v46 = vsel %vm31_vm0, %v2166_v8, 0.0  ;;  %761 = vst.msk [vmem:[#allocation2 + $0x178] sm:$0xff] %vm31_vm0, %v696_v31 }
 0x137   :  { %v1007_v49 = vmul.f32 %v2173_v14, %v2173_v14  ;;  %773 = vst.msk [vmem:[#allocation2 + $0x1d8] sm:$0xff] %vm31_vm0, %v708_v42 }
 0x138   :  { %v893_v3 = vadd.f32 %v892_v61, %v891_v57  ;;  %v1088_v4 = vadd.f32 %v1087_v60, %v1086_v59  ;;  %v902_v57 = vsel %vm31_vm0, %v2173_v14, 0.0  ;;  %v1008_v59 = vmul.f32 %v2180_v40, %v2180_v40  ;;  %v2197_v60 = vld [vmem:[#allocation2 + $0x100] sm:$0xff] }
 0x139   :  { %v1099_v0 = vsel %vm31_vm0, %v1007_v49, 0.0 }
 0x13a   :  { %v895_v9 = vadd.f32 %v894_v6, %v893_v3  ;;  %v1090_v10 = vadd.f32 %v1089_v5, %v1088_v4  ;;  %v904_v3 = vsel %vm31_vm0, %v2180_v40, 0.0  ;;  %v1009_v4 = vmul.f32 %v2188_v52, %v2188_v52  ;;  %v2205_v5 = vld [vmem:[#allocation2 + $0x108] sm:$0xff] }
 0x13b   :  { %v1011_v21 = vmul.f32 %v2205_v5, %v2205_v5  ;;  %v910_v30 = vsel %vm31_vm0, %v2205_v5, 0.0 }
 0x13c   :  { %v897_v19 = vadd.f32 %v896_v12, %v895_v9  ;;  %v1092_v20 = vadd.f32 %v1091_v11, %v1090_v10  ;;  %v1010_v10 = vmul.f32 %v2197_v60, %v2197_v60  ;;  %v1101_v11 = vsel %vm31_vm0, %v1008_v59, 0.0  ;;  %v639_v13 = vpop.f32.mrf.mxu3 }
 0x13d   :  { %v906_v12 = vsel %vm31_vm0, %v2188_v52, 0.0  ;;  %v1103_v22 = vsel %vm31_vm0, %v1009_v4, 0.0  ;;  %v914_v59 = vsel %vm31_vm0, %v2219_v23, 0.0 }
 0x13e   :  { %v899_v37 = vadd.f32 %v898_v18, %v897_v19  ;;  %v1094_v39 = vadd.f32 %v1093_v15, %v1092_v20  ;;  %v2212_v15 = vld [vmem:[#allocation2 + $0x110] sm:$0xff]  ;;  %v908_v20 = vsel %vm31_vm0, %v2197_v60, 0.0  ;;  %v1105_v29 = vsel %vm31_vm0, %v1010_v10, 0.0 }
 0x13f   :  { %v1012_v31 = vmul.f32 %v2212_v15, %v2212_v15  ;;  %v912_v42 = vsel %vm31_vm0, %v2212_v15, 0.0 }
 0x140   :  { %v901_v48 = vadd.f32 %v900_v46, %v899_v37  ;;  %v1096_v50 = vadd.f32 %v1095_v45, %v1094_v39  ;;  %v1107_v39 = vsel %vm31_vm0, %v1011_v21, 0.0  ;;  %v1013_v45 = vmul.f32 %v2219_v23, %v2219_v23  ;;  %v2233_v46 = vld [vmem:[#allocation2 + $0x128] sm:$0xff] }
 0x141   :  { %v918_v21 = vsel %vm31_vm0, %v2233_v46, 0.0 }
 0x142   :  { %v1098_v61 = vadd.f32 %v1097_v54, %v1096_v50  ;;  %v903_v63 = vadd.f32 %v902_v57, %v901_v48  ;;  %v156_v50 = vld [vmem:[#allocation2 + $0x1e0] sm:$0xff]  ;;  %v157_v54 = vld [vmem:[#allocation2 + $0x1e8] sm:$0xff]  ;;  %v1109_v57 = vsel %vm31_vm0, %v1012_v31, 0.0  ;;  %v1111_v10 = vsel %vm31_vm0, %v1013_v45, 0.0 }
 0x144   :  { %v1100_v6 = vadd.f32 %v1099_v0, %v1098_v61  ;;  %v905_v9 = vadd.f32 %v904_v3, %v903_v63  ;;  %v1014_v61 = vmul.f32 %v2226_v33, %v2226_v33  ;;  %v709_v63 = vadd.f32 %v639_v13, %v156_v50  ;;  %v641_v0 = vpop.f32.mrf.mxu3  ;;  %v2240_v3 = vld [vmem:[#allocation2 + $0x130] sm:$0xff] }
 0x145   :  { %v920_v31 = vsel %vm31_vm0, %v2240_v3, 0.0 }
 0x146   :  { %v1102_v18 = vadd.f32 %v1101_v11, %v1100_v6  ;;  %v907_v19 = vadd.f32 %v906_v12, %v905_v9  ;;  %v710_v9 = vadd.f32 %v641_v0, %v157_v54  ;;  %v916_v11 = vsel %vm31_vm0, %v2226_v33, 0.0  ;;  %774 = vst.msk [vmem:[#allocation2 + $0x1e0] sm:$0xff] %vm31_vm0, %v709_v63  ;;  %v2270_v54 = vld [vmem:[#allocation2 + $0x150] sm:$0xff] }
 0x147   :  { %v1015_v12 = vmul.f32 %v2233_v46, %v2233_v46 }
 0x148   :  { %v909_v24 = vadd.f32 %v908_v20, %v907_v19  ;;  %v1104_v27 = vadd.f32 %v1103_v22, %v1102_v18  ;;  %v2248_v18 = vld [vmem:[#allocation2 + $0x138] sm:$0xff]  ;;  %775 = vst.msk [vmem:[#allocation2 + $0x1e8] sm:$0xff] %vm31_vm0, %v710_v9  ;;  %v1113_v20 = vsel %vm31_vm0, %v1014_v61, 0.0  ;;  %v1016_v22 = vmul.f32 %v2240_v3, %v2240_v3 }
 0x14a   :  { %v911_v36 = vadd.f32 %v910_v30, %v909_v24  ;;  %v1106_v37 = vadd.f32 %v1105_v29, %v1104_v27  ;;  %v2256_v24 = vld [vmem:[#allocation2 + $0x140] sm:$0xff]  ;;  %v1115_v30 = vsel %vm31_vm0, %v1015_v12, 0.0  ;;  %v1117_v45 = vsel %vm31_vm0, %v1016_v22, 0.0 }
 0x14b   :  { %v924_v63 = vsel %vm31_vm0, %v2256_v24, 0.0  ;;  %v1020_v12 = vmul.f32 %v2270_v54, %v2270_v54  ;;  %v928_v22 = vsel %vm31_vm0, %v2270_v54, 0.0 }
 0x14c   :  { %v913_v49 = vadd.f32 %v912_v42, %v911_v36  ;;  %v1108_v48 = vadd.f32 %v1107_v39, %v1106_v37  ;;  %v1017_v36 = vmul.f32 %v2248_v18, %v2248_v18  ;;  %v2263_v37 = vld [vmem:[#allocation2 + $0x148] sm:$0xff]  ;;  %v644_v50 = vpop.f32.mrf.mxu3 }
 0x14d   :  { %v1019_v0 = vmul.f32 %v2263_v37, %v2263_v37 }
 0x14e   :  { %v915_v4 = vadd.f32 %v914_v59, %v913_v49  ;;  %v1110_v6 = vadd.f32 %v1109_v57, %v1108_v48  ;;  %v922_v49 = vsel %vm31_vm0, %v2248_v18, 0.0  ;;  %v1018_v48 = vmul.f32 %v2256_v24, %v2256_v24 }
 0x14f   :  { %v1119_v61 = vsel %vm31_vm0, %v1017_v36, 0.0  ;;  %v158_v36 = vld [vmem:[#allocation2 + $0x1f0] sm:$0xff] }
 0x150   :  { %v917_v19 = vadd.f32 %v916_v11, %v915_v4  ;;  %v1112_v13 = vadd.f32 %v1111_v10, %v1110_v6  ;;  %v2277_v4 = vld [vmem:[#allocation2 + $0x158] sm:$0xff]  ;;  %v1121_v10 = vsel %vm31_vm0, %v1018_v48, 0.0  ;;  %v926_v11 = vsel %vm31_vm0, %v2263_v37, 0.0 }
 0x151   :  { %v711_v48 = vadd.f32 %v644_v50, %v158_v36 }
 0x152   :  { %v1114_v27 = vadd.f32 %v1113_v20, %v1112_v13  ;;  %v919_v29 = vadd.f32 %v918_v21, %v917_v19  ;;  %v2284_v20 = vld [vmem:[#allocation2 + $0x160] sm:$0xff]  ;;  %v1123_v21 = vsel %vm31_vm0, %v1019_v0, 0.0 }
 0x153   :  { %776 = vst.msk [vmem:[#allocation2 + $0x1f0] sm:$0xff] %vm31_vm0, %v711_v48 }
 0x154   :  { %v921_v39 = vadd.f32 %v920_v31, %v919_v29  ;;  %v1116_v42 = vadd.f32 %v1115_v30, %v1114_v27  ;;  %v1021_v27 = vmul.f32 %v2277_v4, %v2277_v4  ;;  %v2291_v31 = vld [vmem:[#allocation2 + $0x168] sm:$0xff] }
 0x156   :  { %v923_v57 = vadd.f32 %v922_v49, %v921_v39  ;;  %v1118_v59 = vadd.f32 %v1117_v45, %v1116_v42  ;;  %v159_v39 = vld [vmem:[#allocation2 + $0x1f8] sm:$0xff]  ;;  %v1125_v42 = vsel %vm31_vm0, %v1020_v12, 0.0  ;;  %v930_v45 = vsel %vm31_vm0, %v2277_v4, 0.0 }
 0x157   :  { %v1022_v49 = vmul.f32 %v2284_v20, %v2284_v20 }
 0x158   :  { %v925_v6 = vadd.f32 %v924_v63, %v923_v57  ;;  %v1120_v9 = vadd.f32 %v1119_v61, %v1118_v59  ;;  %v646_v57 = vpop.f32.mrf.mxu3  ;;  %v2298_v63 = vld [vmem:[#allocation2 + $0x170] sm:$0xff] }
 0x159   :  { %v712_v0 = vadd.f32 %v646_v57, %v159_v39  ;;  %v1129_v50 = vsel %vm31_vm0, %v1022_v49, 0.0  ;;  %v936_v36 = vsel %vm31_vm0, %v2298_v63, 0.0 }
 0x15a   :  { %v927_v19 = vadd.f32 %v926_v11, %v925_v6  ;;  %v1122_v13 = vadd.f32 %v1121_v10, %v1120_v9  ;;  %v1127_v6 = vsel %vm31_vm0, %v1021_v27, 0.0  ;;  %v932_v9 = vsel %vm31_vm0, %v2284_v20, 0.0 }
 0x15b   :  { %v1023_v10 = vmul.f32 %v2291_v31, %v2291_v31  ;;  %777 = vst.msk [vmem:[#allocation2 + $0x1f8] sm:$0xff] %vm31_vm0, %v712_v0 }
 0x15c   :  { %v929_v29 = vadd.f32 %v928_v22, %v927_v19  ;;  %v1124_v30 = vadd.f32 %v1123_v21, %v1122_v13  ;;  %v2306_v19 = vld [vmem:[#allocation2 + $0x178] sm:$0xff]  ;;  %v934_v13 = vsel %vm31_vm0, %v2291_v31, 0.0  ;;  %v1024_v21 = vmul.f32 %v2298_v63, %v2298_v63  ;;  %v2314_v22 = vld [vmem:[#allocation2 + $0x180] sm:$0xff] }
 0x15d   :  { %2907 = vst [vmem:[#allocation6_spill] sm:$0xff] %v2314_v22  ;;  %v1025_v39 = vmul.f32 %v2306_v19, %v2306_v19  ;;  %v1026_v48 = vmul.f32 %v2314_v22, %v2314_v22 }
 0x15e   :  { %v931_v59 = vadd.f32 %v930_v45, %v929_v29  ;;  %v1126_v61 = vadd.f32 %v1125_v42, %v1124_v30  ;;  %v1131_v30 = vsel %vm31_vm0, %v1023_v10, 0.0  ;;  %v2321_v42 = vld [vmem:[#allocation2 + $0x188] sm:$0xff]  ;;  %v1133_v57 = vsel %vm31_vm0, %v1024_v21, 0.0 }
 0x15f   :  { %2908 = vst [vmem:[#allocation7_spill] sm:$0xff] %v2321_v42  ;;  %v1027_v10 = vmul.f32 %v2321_v42, %v2321_v42  ;;  %v1137_v21 = vsel %vm31_vm0, %v1026_v48, 0.0 }
 0x160   :  { %v1128_v11 = vadd.f32 %v1127_v6, %v1126_v61  ;;  %v933_v12 = vadd.f32 %v932_v9, %v931_v59  ;;  %v938_v59 = vsel %vm31_vm0, %v2306_v19, 0.0  ;;  %v2328_v61 = vld [vmem:[#allocation2 + $0x190] sm:$0xff]  ;;  %v940_v9 = vsel %vm31_vm0, %v2314_v22, 0.0 }
 0x161   :  { %2909 = vst [vmem:[#allocation8_spill] sm:$0xff] %v2328_v61 }
 0x162   :  { %v1130_v27 = vadd.f32 %v1129_v50, %v1128_v11  ;;  %v935_v29 = vadd.f32 %v934_v13, %v933_v12  ;;  %v1135_v11 = vsel %vm31_vm0, %v1025_v39, 0.0  ;;  %v2335_v12 = vld [vmem:[#allocation2 + $0x198] sm:$0xff]  ;;  %v944_v39 = vsel %vm31_vm0, %v2328_v61, 0.0 }
 0x163   :  { %2910 = vst [vmem:[#allocation9_spill] sm:$0xff] %v2335_v12 }
 0x164   :  { %v1132_v45 = vadd.f32 %v1131_v30, %v1130_v27  ;;  %v937_v49 = vadd.f32 %v936_v36, %v935_v29  ;;  %v942_v27 = vsel %vm31_vm0, %v2321_v42, 0.0  ;;  %v1028_v29 = vmul.f32 %v2328_v61, %v2328_v61  ;;  %v2342_v30 = vld [vmem:[#allocation2 + $0x1a0] sm:$0xff] }
 0x165   :  { %2911 = vst [vmem:[#allocation10_spill] sm:$0xff] %v2342_v30 }
 0x166   :  { %v1134_v0 = vadd.f32 %v1133_v57, %v1132_v45  ;;  %v939_v6 = vadd.f32 %v938_v59, %v937_v49  ;;  %v1139_v49 = vsel %vm31_vm0, %v1027_v10, 0.0  ;;  %v1029_v57 = vmul.f32 %v2335_v12, %v2335_v12  ;;  %v2349_v59 = vld [vmem:[#allocation2 + $0x1a8] sm:$0xff] }
 0x167   :  { %2912 = vst [vmem:[#allocation11_spill] sm:$0xff] %v2349_v59 }
 0x168   :  { %v941_v50 = vadd.f32 %v940_v9, %v939_v6  ;;  %v1136_v13 = vadd.f32 %v1135_v11, %v1134_v0  ;;  %v1141_v6 = vsel %vm31_vm0, %v1028_v29, 0.0  ;;  %v946_v9 = vsel %vm31_vm0, %v2335_v12, 0.0 }
 0x169   :  { %v1030_v11 = vmul.f32 %v2342_v30, %v2342_v30  ;;  %v950_v12 = vsel %vm31_vm0, %v2349_v59, 0.0 }
 0x16a   :  { %v943_v36 = vadd.f32 %v942_v27, %v941_v50  ;;  %v1138_v45 = vadd.f32 %v1137_v21, %v1136_v13  ;;  %v2356_v50 = vld [vmem:[#allocation2 + $0x1b0] sm:$0xff]  ;;  %v1143_v21 = vsel %vm31_vm0, %v1029_v57, 0.0  ;;  %v948_v27 = vsel %vm31_vm0, %v2342_v30, 0.0 }
 0x16b   :  { %2913 = vst [vmem:[#allocation12_spill] sm:$0xff] %v2356_v50  ;;  %v952_v30 = vsel %vm31_vm0, %v2356_v50, 0.0 }
 0x16c   :  { %v945_v48 = vadd.f32 %v944_v39, %v943_v36  ;;  %v1140_v0 = vadd.f32 %v1139_v49, %v1138_v45  ;;  %v1031_v36 = vmul.f32 %v2349_v59, %v2349_v59  ;;  %v2363_v45 = vld [vmem:[#allocation2 + $0x1b8] sm:$0xff]  ;;  %v1145_v39 = vsel %vm31_vm0, %v1030_v11, 0.0 }
 0x16d   :  { %2914 = vst [vmem:[#allocation13_spill] sm:$0xff] %v2363_v45  ;;  %v954_v59 = vsel %vm31_vm0, %v2363_v45, 0.0 }
 0x16e   :  { %v947_v10 = vadd.f32 %v946_v9, %v945_v48  ;;  %v1142_v13 = vadd.f32 %v1141_v6, %v1140_v0  ;;  %v1032_v48 = vmul.f32 %v2356_v50, %v2356_v50  ;;  %v2370_v0 = vld [vmem:[#allocation2 + $0x1c0] sm:$0xff]  ;;  %v1147_v9 = vsel %vm31_vm0, %v1031_v36, 0.0 }
 0x16f   :  { %2915 = vst [vmem:[#allocation14_spill] sm:$0xff] %v2370_v0 }
 0x170   :  { %v949_v29 = vadd.f32 %v948_v27, %v947_v10  ;;  %v1144_v49 = vadd.f32 %v1143_v21, %v1142_v13  ;;  %v1033_v10 = vmul.f32 %v2363_v45, %v2363_v45  ;;  %v2377_v13 = vld [vmem:[#allocation2 + $0x1c8] sm:$0xff]  ;;  %v1149_v27 = vsel %vm31_vm0, %v1032_v48, 0.0  ;;  %v2394_v45 = vld [vmem:[#allocation2 + $0x1d8] sm:$0xff] }
 0x171   :  { %2916 = vst [vmem:[#allocation15_spill] sm:$0xff] %v2377_v13  ;;  %v1035_v50 = vmul.f32 %v2377_v13, %v2377_v13 }
 0x172   :  { %v1146_v57 = vadd.f32 %v1145_v39, %v1144_v49  ;;  %v951_v6 = vadd.f32 %v950_v12, %v949_v29  ;;  %v1034_v12 = vmul.f32 %v2370_v0, %v2370_v0  ;;  %v1151_v49 = vsel %vm31_vm0, %v1033_v10, 0.0  ;;  %2918 = vst [vmem:[#allocation17_spill] sm:$0xff] %v2394_v45 }
 0x173   :  { %v956_v39 = vsel %vm31_vm0, %v2370_v0, 0.0  ;;  %v1155_v10 = vsel %vm31_vm0, %v1035_v50, 0.0  ;;  %v1037_v50 = vmul.f32 %v2394_v45, %v2394_v45 }
 0x174   :  { %v953_v11 = vadd.f32 %v952_v30, %v951_v6  ;;  %v1148_v21 = vadd.f32 %v1147_v9, %v1146_v57  ;;  %v2389_v30 = vld [vmem:[#allocation2 + $0x1d0] sm:$0xff]  ;;  %v1153_v6 = vsel %vm31_vm0, %v1034_v12, 0.0  ;;  %v958_v9 = vsel %vm31_vm0, %v2377_v13, 0.0 }
 0x175   :  { %2917 = vst [vmem:[#allocation16_spill] sm:$0xff] %v2389_v30  ;;  %v962_v12 = vsel %vm31_vm0, %v2394_v45, 0.0 }
 0x176   :  { %v955_v29 = vadd.f32 %v954_v59, %v953_v11  ;;  %v1150_v36 = vadd.f32 %v1149_v27, %v1148_v21  ;;  %v960_v21 = vsel %vm31_vm0, %v2389_v30, 0.0  ;;  %v1036_v27 = vmul.f32 %v2389_v30, %v2389_v30 }
 0x178   :  { %v957_v57 = vadd.f32 %v956_v39, %v955_v29  ;;  %v1152_v48 = vadd.f32 %v1151_v49, %v1150_v36  ;;  %v2401_v36 = vld [vmem:[#allocation2 + $0x1e0] sm:$0xff]  ;;  %v2405_v39 = vld [vmem:[#allocation2 + $0x1e8] sm:$0xff] }
 0x179   :  { %2919 = vst [vmem:[#allocation18_spill] sm:$0xff] %v2401_v36 }
 0x17a   :  { %v959_v59 = vadd.f32 %v958_v9, %v957_v57  ;;  %v1154_v11 = vadd.f32 %v1153_v6, %v1152_v48  ;;  %2920 = vst [vmem:[#allocation19_spill] sm:$0xff] %v2405_v39  ;;  %v1157_v57 = vsel %vm31_vm0, %v1036_v27, 0.0  ;;  %v964_v48 = vsel %vm31_vm0, %v2401_v36, 0.0 }
 0x17b   :  { %v1038_v27 = vmul.f32 %v2401_v36, %v2401_v36 }
 0x17c   :  { %v961_v0 = vadd.f32 %v960_v21, %v959_v59  ;;  %v1156_v29 = vadd.f32 %v1155_v10, %v1154_v11  ;;  %v2412_v59 = vld [vmem:[#allocation2 + $0x1f0] sm:$0xff]  ;;  %v966_v11 = vsel %vm31_vm0, %v2405_v39, 0.0  ;;  %v2416_v21 = vld [vmem:[#allocation2 + $0x1f8] sm:$0xff] }
 0x17d   :  { %2921 = vst [vmem:[#allocation20_spill] sm:$0xff] %v2416_v21  ;;  %v1040_v36 = vmul.f32 %v2412_v59, %v2412_v59 }
 0x17e   :  { %v963_v49 = vadd.f32 %v962_v12, %v961_v0  ;;  %v1158_v6 = vadd.f32 %v1157_v57, %v1156_v29  ;;  %v1159_v0 = vsel %vm31_vm0, %v1037_v50, 0.0  ;;  %v968_v12 = vsel %vm31_vm0, %v2412_v59, 0.0 }
 0x17f   :  { %v970_v29 = vsel %vm31_vm0, %v2416_v21, 0.0  ;;  %v1161_v57 = vsel %vm31_vm0, %v1038_v27, 0.0 }
 0x180   :  { %v965_v9 = vadd.f32 %v964_v48, %v963_v49  ;;  %v1160_v45 = vadd.f32 %v1159_v0, %v1158_v6  ;;  %v1039_v48 = vmul.f32 %v2405_v39, %v2405_v39  ;;  %v1165_v6 = vsel %vm31_vm0, %v1040_v36, 0.0 }
 0x182   :  { %v967_v10 = vadd.f32 %v966_v11, %v965_v9  ;;  %v1162_v9 = vadd.f32 %v1161_v57, %v1160_v45  ;;  %v1163_v50 = vsel %vm31_vm0, %v1039_v48, 0.0 }
 0x184   :  { %v969_v30 = vadd.f32 %v968_v12, %v967_v10  ;;  %v1164_v13 = vadd.f32 %v1163_v50, %v1162_v9  ;;  %v1041_v10 = vmul.f32 %v2416_v21, %v2416_v21 }
 0x186   :  { %v971_v49 = vadd.f32 %v970_v29, %v969_v30  ;;  %v1166_v30 = vadd.f32 %v1165_v6, %v1164_v13  ;;  %v1167_v27 = vsel %vm31_vm0, %v1041_v10, 0.0 }
 0x188   :  { %v972_v11 = vrot.slane %v971_v49, 4  ;;  %v1168_v12 = vadd.f32 %v1167_v27, %v1166_v30 }
 0x18a   :  { %v973_v61 = vadd.f32 %v972_v11, %v971_v49  ;;  %v1169_v45 = vrot.slane %v1168_v12, 4 }
 0x18c   :  { %v974_v0 = vrot.slane %v973_v61, 2  ;;  %v1170_v39 = vadd.f32 %v1169_v45, %v1168_v12 }
 0x18e   :  { %v975_v29 = vadd.f32 %v974_v0, %v973_v61  ;;  %v1171_v42 = vrot.slane %v1170_v39, 2 }
 0x190   :  { %v976_v57 = vrot.slane %v975_v29, 1  ;;  %v1172_v9 = vadd.f32 %v1171_v42, %v1170_v39 }
 0x192   :  { %v977_v48 = vadd.f32 %v976_v57, %v975_v29  ;;  %v1173_v13 = vrot.slane %v1172_v9, 1  ;;  %v1747_v57 = vld [vmem:[#allocation2] sm:$0xff] }
 0x194   :  { %v2435_v22 = vmul.f32 0.001953125, %v977_v48  ;;  %v1174_v11 = vadd.f32 %v1173_v13, %v1172_v9  ;;  %v1748_v9 = vld [vmem:[#allocation2 + $0x8] sm:$0xff] }
 0x196   :  { %v1176_v50 = vmul.f32 0.001953125, %v1174_v11  ;;  %v1177_v61 = vmul.f32 %v2435_v22, %v2435_v22  ;;  %v1180_v48 = vsub.f32 %v1747_v57, %v2435_v22  ;;  %v1181_v13 = vsub.f32 %v1748_v9, %v2435_v22  ;;  %v1749_v11 = vld [vmem:[#allocation2 + $0x10] sm:$0xff] }
 0x197   :  { %v1186_v57 = vsub.f32 %v1996_v47, %v2435_v22  ;;  %v1190_v47 = vsub.f32 %v2023_v25, %v2435_v22  ;;  %v1193_v25 = vsub.f32 %v2053_v55, %v2435_v22  ;;  %v1195_v55 = vsub.f32 %v2083_v35, %v2435_v22 }
 0x198   :  { %v1178_v6 = vsub.f32 %v1176_v50, %v1177_v61  ;;  %v1182_v50 = vsub.f32 %v1749_v11, %v2435_v22  ;;  %v1187_v11 = vsub.f32 %v2001_v56, %v2435_v22  ;;  %v1191_v56 = vsub.f32 %v2039_v41, %v2435_v22 }
 0x199   :  { %v1197_v35 = vsub.f32 %v2081_v32, %v2435_v22  ;;  %v1199_v32 = vsub.f32 %v2101_v51, %v2435_v22  ;;  %v1201_v51 = vsub.f32 %v2113_v1, %v2435_v22  ;;  %v1203_v1 = vsub.f32 %v2128_v26, %v2435_v22 }
 0x19a   :  { %v1179_v10 = vmax.f32 %v1178_v6, 0.0  ;;  %v1750_v6 = vld [vmem:[#allocation2 + $0x18] sm:$0xff]  ;;  %v1205_v26 = vsub.f32 %v2145_v43, %v2435_v22  ;;  %v1207_v43 = vsub.f32 %v2161_v2, %v2435_v22  ;;  %v1209_v2 = vsub.f32 %v2173_v14, %v2435_v22 }
 0x19b   :  { %v1211_v14 = vsub.f32 %v2188_v52, %v2435_v22  ;;  %v1213_v52 = vsub.f32 %v2205_v5, %v2435_v22  ;;  %v1215_v5 = vsub.f32 %v2219_v23, %v2435_v22  ;;  %v1217_v23 = vsub.f32 %v2233_v46, %v2435_v22 }
 0x19c   :  { %v1244_v30 = vadd.f32 1e-05, %v1179_v10  ;;  %v1183_v10 = vsub.f32 %v1750_v6, %v2435_v22  ;;  %v1219_v46 = vsub.f32 %v2248_v18, %v2435_v22  ;;  %v1221_v18 = vsub.f32 %v2263_v37, %v2435_v22 }
 0x19d   :  { %v1223_v37 = vsub.f32 %v2277_v4, %v2435_v22  ;;  %v1225_v4 = vsub.f32 %v2291_v31, %v2435_v22  ;;  %v1227_v31 = vsub.f32 %v2306_v19, %v2435_v22  ;;  %v2923_v19 = vld [vmem:[#allocation7_spill] sm:$0xff] }
 0x19e   :  { %1745 = vrsqrt.f32 %v1244_v30  ;;  %vm1251_vm2 = vweird.f32 %v1244_v30 }
 0x1a4   :  { %v1746_v0 = vpop.eup %1745 }
 0x1a5   :  { %v1246_v27 = vmul.f32 %v1746_v0, %v1244_v30  ;;  %vm1252_vm1 = vweird.f32 %v1746_v0  ;;  %v1751_v30 = vld [vmem:[#allocation2 + $0x20] sm:$0xff] }
 0x1a6   :  { %vm1253_vm3 = vmor %vm1251_vm2, %vm1252_vm1 }
 0x1a7   :  { %v1247_v12 = vmul.f32 %v1746_v0, %v1246_v27 }
 0x1a9   :  { %v1248_v42 = vmul.f32 0.5, %v1247_v12 }
 0x1ab   :  { %v1249_v39 = vsub.f32 1.5, %v1248_v42  ;;  %v1752_v42 = vld [vmem:[#allocation2 + $0x28] sm:$0xff] }
 0x1ad   :  { %v1250_v29 = vmul.f32 %v1746_v0, %v1249_v39  ;;  %v1185_v39 = vsub.f32 %v1752_v42, %v2435_v22 }
 0x1af   :  { %v2443_v45 = vsel %vm1253_vm3, %v1746_v0, %v1250_v29  ;;  %v1184_v0 = vsub.f32 %v1751_v30, %v2435_v22 }
 0x1b0   :  { %v1255_v61 = vmul.f32 %v2443_v45, %v1180_v48  ;;  %v1256_v27 = vmul.f32 %v2443_v45, %v1181_v13  ;;  %v1257_v12 = vmul.f32 %v2443_v45, %v1182_v50  ;;  %v1258_v29 = vmul.f32 %v2443_v45, %v1183_v10 }
 0x1b1   :  { %v1259_v48 = vmul.f32 %v2443_v45, %v1184_v0  ;;  %v1260_v13 = vmul.f32 %v2443_v45, %v1185_v39  ;;  %v1188_v50 = vsub.f32 %v2007_v7, %v2435_v22  ;;  %v1261_v30 = vmul.f32 %v2443_v45, %v1186_v57 }
 0x1b2   :  { %v1319_v9 = vmax.f32 %v1255_v61, 0.0  ;;  %v1320_v6 = vmax.f32 %v1256_v27, 0.0  ;;  %v1321_v42 = vmax.f32 %v1257_v12, 0.0  ;;  %v1189_v10 = vsub.f32 %v2014_v17, %v2435_v22 }
 0x1b3   :  { %v1262_v61 = vmul.f32 %v2443_v45, %v1187_v11  ;;  %v1322_v0 = vmax.f32 %v1258_v29, 0.0  ;;  %v1263_v27 = vmul.f32 %v2443_v45, %v1188_v50  ;;  %v1323_v39 = vmax.f32 %v1259_v48, 0.0 }
 0x1b4   :  { %v1383_v49 = vpack.c.bf16 %v1319_v9, %v1319_v9  ;;  %v1192_v7 = vsub.f32 %v2044_v44, %v2435_v22  ;;  %v1264_v12 = vmul.f32 %v2443_v45, %v1189_v10  ;;  %v1324_v57 = vmax.f32 %v1260_v13, 0.0 }
 0x1b5   :  { %v1384_v17 = vpack.c.bf16 %v1320_v6, %v1320_v6  ;;  %v1265_v11 = vmul.f32 %v2443_v45, %v1190_v47  ;;  %v1325_v29 = vmax.f32 %v1261_v30, 0.0  ;;  %v1385_v36 = vpack.c.bf16 %v1321_v42, %v1321_v42 }
 0x1b6   :  { %v1266_v41 = vmul.f32 %v2443_v45, %v1191_v56  ;;  %v1326_v21 = vmax.f32 %v1262_v61, 0.0  ;;  %v1386_v50 = vpack.c.bf16 %v1322_v0, %v1322_v0  ;;  %v1194_v48 = vsub.f32 %v2057_v62, %v2435_v22  ;;  %1448 = vst.msk [vmem:[%s2891_s2] sm:$0xf] %vm1447_vm4, %v1383_v49 }
 0x1b7   :  { %v1267_v44 = vmul.f32 %v2443_v45, %v1192_v7  ;;  %v1327_v9 = vmax.f32 %v1263_v27, 0.0  ;;  %v1387_v13 = vpack.c.bf16 %v1323_v39, %v1323_v39  ;;  %v1268_v6 = vmul.f32 %v2443_v45, %v1193_v25  ;;  %1449 = vst.msk [vmem:[%s2891_s2 + $0x4] sm:$0xf] %vm1447_vm4, %v1384_v17 }
 0x1b8   :  { %v1328_v30 = vmax.f32 %v1264_v12, 0.0  ;;  %v1388_v42 = vpack.c.bf16 %v1324_v57, %v1324_v57  ;;  %v1196_v62 = vsub.f32 %v2076_v28, %v2435_v22  ;;  %v1269_v10 = vmul.f32 %v2443_v45, %v1194_v48  ;;  %1450 = vst.msk [vmem:[%s2891_s2 + $0x8] sm:$0xf] %vm1447_vm4, %v1385_v36 }
 0x1b9   :  { %v1329_v47 = vmax.f32 %v1265_v11, 0.0  ;;  %v1389_v61 = vpack.c.bf16 %v1325_v29, %v1325_v29  ;;  %v1270_v49 = vmul.f32 %v2443_v45, %v1195_v55  ;;  %v1330_v0 = vmax.f32 %v1266_v41, 0.0  ;;  %1451 = vst.msk [vmem:[%s2891_s2 + $0xc] sm:$0xf] %vm1447_vm4, %v1386_v50 }
 0x1ba   :  { %v1390_v56 = vpack.c.bf16 %v1326_v21, %v1326_v21  ;;  %v1198_v28 = vsub.f32 %v2088_v38, %v2435_v22  ;;  %v1271_v27 = vmul.f32 %v2443_v45, %v1196_v62  ;;  %v1331_v39 = vmax.f32 %v1267_v44, 0.0  ;;  %1452 = vst.msk [vmem:[%s2891_s2 + $0x10] sm:$0xf] %vm1447_vm4, %v1387_v13 }
 0x1bb   :  { %v1391_v7 = vpack.c.bf16 %v1327_v9, %v1327_v9  ;;  %v1272_v21 = vmul.f32 %v2443_v45, %v1197_v35  ;;  %v1332_v36 = vmax.f32 %v1268_v6, 0.0  ;;  %v1392_v12 = vpack.c.bf16 %v1328_v30, %v1328_v30  ;;  %1453 = vst.msk [vmem:[%s2891_s2 + $0x14] sm:$0xf] %vm1447_vm4, %v1388_v42 }
 0x1bc   :  { %v1200_v38 = vsub.f32 %v2106_v58, %v2435_v22  ;;  %v1273_v57 = vmul.f32 %v2443_v45, %v1198_v28  ;;  %v1333_v17 = vmax.f32 %v1269_v10, 0.0  ;;  %v1393_v25 = vpack.c.bf16 %v1329_v47, %v1329_v47  ;;  %1454 = vst.msk [vmem:[%s2891_s2 + $0x18] sm:$0xf] %vm1447_vm4, %v1389_v61 }
 0x1bd   :  { %v1274_v11 = vmul.f32 %v2443_v45, %v1199_v32  ;;  %v1334_v29 = vmax.f32 %v1270_v49, 0.0  ;;  %v1394_v41 = vpack.c.bf16 %v1330_v0, %v1330_v0  ;;  %1455 = vst.msk [vmem:[%s2891_s2 + $0x1c] sm:$0xf] %vm1447_vm4, %v1390_v56  ;;  %v1202_v58 = vsub.f32 %v2120_v16, %v2435_v22 }
 0x1be   :  { %v1275_v50 = vmul.f32 %v2443_v45, %v1200_v38  ;;  %v1335_v48 = vmax.f32 %v1271_v27, 0.0  ;;  %v1395_v44 = vpack.c.bf16 %v1331_v39, %v1331_v39  ;;  %1456 = vst.msk [vmem:[%s2891_s2 + $0x20] sm:$0xf] %vm1447_vm4, %v1391_v7  ;;  %v1276_v9 = vmul.f32 %v2443_v45, %v1201_v51 }
 0x1bf   :  { %v1336_v13 = vmax.f32 %v1272_v21, 0.0  ;;  %v1396_v55 = vpack.c.bf16 %v1332_v36, %v1332_v36  ;;  %1457 = vst.msk [vmem:[%s2891_s2 + $0x24] sm:$0xf] %vm1447_vm4, %v1392_v12  ;;  %v1204_v16 = vsub.f32 %v2137_v34, %v2435_v22  ;;  %v1277_v6 = vmul.f32 %v2443_v45, %v1202_v58 }
 0x1c0   :  { %v1337_v30 = vmax.f32 %v1273_v57, 0.0  ;;  %v1397_v42 = vpack.c.bf16 %v1333_v17, %v1333_v17  ;;  %1458 = vst.msk [vmem:[%s2891_s2 + $0x28] sm:$0xf] %vm1447_vm4, %v1393_v25  ;;  %v1278_v62 = vmul.f32 %v2443_v45, %v1203_v1  ;;  %v1338_v10 = vmax.f32 %v1274_v11, 0.0 }
 0x1c1   :  { %v1398_v47 = vpack.c.bf16 %v1334_v29, %v1334_v29  ;;  %1459 = vst.msk [vmem:[%s2891_s2 + $0x2c] sm:$0xf] %vm1447_vm4, %v1394_v41  ;;  %v1206_v34 = vsub.f32 %v2152_v53, %v2435_v22  ;;  %v1279_v61 = vmul.f32 %v2443_v45, %v1204_v16  ;;  %v1339_v35 = vmax.f32 %v1275_v50, 0.0 }
 0x1c2   :  { %v1399_v49 = vpack.c.bf16 %v1335_v48, %v1335_v48  ;;  %1460 = vst.msk [vmem:[%s2891_s2 + $0x30] sm:$0xf] %vm1447_vm4, %v1395_v44  ;;  %v1280_v0 = vmul.f32 %v2443_v45, %v1205_v26  ;;  %v1340_v56 = vmax.f32 %v1276_v9, 0.0  ;;  %v1400_v28 = vpack.c.bf16 %v1336_v13, %v1336_v13 }
 0x1c3   :  { %1461 = vst.msk [vmem:[%s2891_s2 + $0x34] sm:$0xf] %vm1447_vm4, %v1396_v55  ;;  %v1208_v53 = vsub.f32 %v2166_v8, %v2435_v22  ;;  %v1281_v27 = vmul.f32 %v2443_v45, %v1206_v34  ;;  %v1341_v39 = vmax.f32 %v1277_v6, 0.0  ;;  %v1401_v7 = vpack.c.bf16 %v1337_v30, %v1337_v30 }
 0x1c4   :  { %1462 = vst.msk [vmem:[%s2891_s2 + $0x38] sm:$0xf] %vm1447_vm4, %v1397_v42  ;;  %v1282_v32 = vmul.f32 %v2443_v45, %v1207_v43  ;;  %v1342_v21 = vmax.f32 %v1278_v62, 0.0  ;;  %v1402_v36 = vpack.c.bf16 %v1338_v10, %v1338_v10  ;;  %v1210_v8 = vsub.f32 %v2180_v40, %v2435_v22 }
 0x1c5   :  { %1463 = vst.msk [vmem:[%s2891_s2 + $0x3c] sm:$0xf] %vm1447_vm4, %v1398_v47  ;;  %v1283_v12 = vmul.f32 %v2443_v45, %v1208_v53  ;;  %v1343_v38 = vmax.f32 %v1279_v61, 0.0  ;;  %v1403_v57 = vpack.c.bf16 %v1339_v35, %v1339_v35  ;;  %v1284_v17 = vmul.f32 %v2443_v45, %v1209_v2 }
 0x1c6   :  { %1464 = vst.msk [vmem:[%s2891_s2 + $0x40] sm:$0xf] %vm1447_vm4, %v1399_v49  ;;  %v1344_v25 = vmax.f32 %v1280_v0, 0.0  ;;  %v1404_v51 = vpack.c.bf16 %v1340_v56, %v1340_v56  ;;  %v1212_v40 = vsub.f32 %v2197_v60, %v2435_v22  ;;  %v1285_v11 = vmul.f32 %v2443_v45, %v1210_v8 }
 0x1c7   :  { %1465 = vst.msk [vmem:[%s2891_s2 + $0x44] sm:$0xf] %vm1447_vm4, %v1400_v28  ;;  %v1345_v29 = vmax.f32 %v1281_v27, 0.0  ;;  %v1405_v41 = vpack.c.bf16 %v1341_v39, %v1341_v39  ;;  %v1286_v58 = vmul.f32 %v2443_v45, %v1211_v14  ;;  %v1346_v50 = vmax.f32 %v1282_v32, 0.0 }
 0x1c8   :  { %1466 = vst.msk [vmem:[%s2891_s2 + $0x48] sm:$0xf] %vm1447_vm4, %v1401_v7  ;;  %v1406_v48 = vpack.c.bf16 %v1342_v21, %v1342_v21  ;;  %v1214_v60 = vsub.f32 %v2212_v15, %v2435_v22  ;;  %v1287_v44 = vmul.f32 %v2443_v45, %v1212_v40  ;;  %v1347_v1 = vmax.f32 %v1283_v12, 0.0 }
 0x1c9   :  { %1467 = vst.msk [vmem:[%s2891_s2 + $0x4c] sm:$0xf] %vm1447_vm4, %v1402_v36  ;;  %v1407_v9 = vpack.c.bf16 %v1343_v38, %v1343_v38  ;;  %v1288_v13 = vmul.f32 %v2443_v45, %v1213_v52  ;;  %v1348_v55 = vmax.f32 %v1284_v17, 0.0  ;;  %v1408_v16 = vpack.c.bf16 %v1344_v25, %v1344_v25 }
 0x1ca   :  { %1468 = vst.msk [vmem:[%s2891_s2 + $0x50] sm:$0xf] %vm1447_vm4, %v1403_v57  ;;  %v1216_v15 = vsub.f32 %v2226_v33, %v2435_v22  ;;  %v1289_v6 = vmul.f32 %v2443_v45, %v1214_v60  ;;  %v1349_v30 = vmax.f32 %v1285_v11, 0.0  ;;  %v1409_v42 = vpack.c.bf16 %v1345_v29, %v1345_v29 }
 0x1cb   :  { %1469 = vst.msk [vmem:[%s2891_s2 + $0x54] sm:$0xf] %vm1447_vm4, %v1404_v51  ;;  %v1290_v26 = vmul.f32 %v2443_v45, %v1215_v5  ;;  %v1350_v62 = vmax.f32 %v1286_v58, 0.0  ;;  %v1410_v10 = vpack.c.bf16 %v1346_v50, %v1346_v50  ;;  %v1218_v33 = vsub.f32 %v2240_v3, %v2435_v22 }
 0x1cc   :  { %1470 = vst.msk [vmem:[%s2891_s2 + $0x58] sm:$0xf] %vm1447_vm4, %v1405_v41  ;;  %v1291_v47 = vmul.f32 %v2443_v45, %v1216_v15  ;;  %v1351_v34 = vmax.f32 %v1287_v44, 0.0  ;;  %v1411_v61 = vpack.c.bf16 %v1347_v1, %v1347_v1  ;;  %v1292_v35 = vmul.f32 %v2443_v45, %v1217_v23 }
 0x1cd   :  { %1471 = vst.msk [vmem:[%s2891_s2 + $0x5c] sm:$0xf] %vm1447_vm4, %v1406_v48  ;;  %v1352_v49 = vmax.f32 %v1288_v13, 0.0  ;;  %v1412_v43 = vpack.c.bf16 %v1348_v55, %v1348_v55  ;;  %v1220_v3 = vsub.f32 %v2256_v24, %v2435_v22  ;;  %v1293_v0 = vmul.f32 %v2443_v45, %v1218_v33  ;;  %v2924_v13 = vld [vmem:[#allocation8_spill] sm:$0xff] }
 0x1ce   :  { %1472 = vst.msk [vmem:[%s2891_s2 + $0x60] sm:$0xf] %vm1447_vm4, %v1407_v9  ;;  %v1353_v56 = vmax.f32 %v1289_v6, 0.0  ;;  %v1413_v28 = vpack.c.bf16 %v1349_v30, %v1349_v30  ;;  %v1294_v53 = vmul.f32 %v2443_v45, %v1219_v46  ;;  %v1354_v27 = vmax.f32 %v1290_v26, 0.0  ;;  %v2925_v30 = vld [vmem:[#allocation9_spill] sm:$0xff]  ;;  %v2927_v46 = vld [vmem:[#allocation11_spill] sm:$0xff] }
 0x1cf   :  { %1473 = vst.msk [vmem:[%s2891_s2 + $0x64] sm:$0xf] %vm1447_vm4, %v1408_v16  ;;  %v1414_v39 = vpack.c.bf16 %v1350_v62, %v1350_v62  ;;  %v1222_v24 = vsub.f32 %v2270_v54, %v2435_v22  ;;  %v1295_v7 = vmul.f32 %v2443_v45, %v1220_v3  ;;  %v1355_v2 = vmax.f32 %v1291_v47, 0.0 }
 0x1d0   :  { %1474 = vst.msk [vmem:[%s2891_s2 + $0x68] sm:$0xf] %vm1447_vm4, %v1409_v42  ;;  %v1415_v32 = vpack.c.bf16 %v1351_v34, %v1351_v34  ;;  %v1296_v21 = vmul.f32 %v2443_v45, %v1221_v18  ;;  %v1356_v36 = vmax.f32 %v1292_v35, 0.0  ;;  %v1416_v8 = vpack.c.bf16 %v1352_v49, %v1352_v49 }
 0x1d1   :  { %1475 = vst.msk [vmem:[%s2891_s2 + $0x6c] sm:$0xf] %vm1447_vm4, %v1410_v10  ;;  %v1224_v54 = vsub.f32 %v2284_v20, %v2435_v22  ;;  %v1297_v12 = vmul.f32 %v2443_v45, %v1222_v24  ;;  %v1357_v38 = vmax.f32 %v1293_v0, 0.0  ;;  %v1417_v57 = vpack.c.bf16 %v1353_v56, %v1353_v56  ;;  %v2926_v10 = vld [vmem:[#allocation10_spill] sm:$0xff]  ;;  %v2928_v0 = vld [vmem:[#allocation12_spill] sm:$0xff] }
 0x1d2   :  { %1476 = vst.msk [vmem:[%s2891_s2 + $0x70] sm:$0xf] %vm1447_vm4, %v1411_v61  ;;  %v1298_v14 = vmul.f32 %v2443_v45, %v1223_v37  ;;  %v1358_v17 = vmax.f32 %v1294_v53, 0.0  ;;  %v1418_v25 = vpack.c.bf16 %v1354_v27, %v1354_v27  ;;  %v1226_v20 = vsub.f32 %v2298_v63, %v2435_v22  ;;  %v2922_v63 = vld [vmem:[#allocation6_spill] sm:$0xff]  ;;  %v2929_v27 = vld [vmem:[#allocation13_spill] sm:$0xff] }
 0x1d3   :  { %1477 = vst.msk [vmem:[%s2891_s2 + $0x74] sm:$0xf] %vm1447_vm4, %v1412_v43  ;;  %v1299_v51 = vmul.f32 %v2443_v45, %v1224_v54  ;;  %v1359_v40 = vmax.f32 %v1295_v7, 0.0  ;;  %v1419_v11 = vpack.c.bf16 %v1355_v2, %v1355_v2  ;;  %v1300_v29 = vmul.f32 %v2443_v45, %v1225_v4  ;;  %v2931_v54 = vld [vmem:[#allocation15_spill] sm:$0xff] }
 0x1d4   :  { %1478 = vst.msk [vmem:[%s2891_s2 + $0x78] sm:$0xf] %vm1447_vm4, %v1413_v28  ;;  %v1360_v41 = vmax.f32 %v1296_v21, 0.0  ;;  %v1420_v52 = vpack.c.bf16 %v1356_v36, %v1356_v36  ;;  %v1228_v58 = vsub.f32 %v2922_v63, %v2435_v22  ;;  %v1301_v50 = vmul.f32 %v2443_v45, %v1226_v20 }
 0x1d5   :  { %1479 = vst.msk [vmem:[%s2891_s2 + $0x7c] sm:$0xf] %vm1447_vm4, %v1414_v39  ;;  %v1361_v48 = vmax.f32 %v1297_v12, 0.0  ;;  %v1421_v60 = vpack.c.bf16 %v1357_v38, %v1357_v38  ;;  %v1229_v44 = vsub.f32 %v2923_v19, %v2435_v22  ;;  %v1302_v1 = vmul.f32 %v2443_v45, %v1227_v31 }
 0x1d6   :  { %1480 = vst.msk [vmem:[%s2891_s2 + $0x80] sm:$0xf] %vm1447_vm4, %v1415_v32  ;;  %v1362_v9 = vmax.f32 %v1298_v14, 0.0  ;;  %v1422_v5 = vpack.c.bf16 %v1358_v17, %v1358_v17  ;;  %v1230_v55 = vsub.f32 %v2924_v13, %v2435_v22  ;;  %v1303_v16 = vmul.f32 %v2443_v45, %v1228_v58  ;;  %v2930_v32 = vld [vmem:[#allocation14_spill] sm:$0xff]  ;;  %v2932_v14 = vld [vmem:[#allocation16_spill] sm:$0xff] }
 0x1d7   :  { %1481 = vst.msk [vmem:[%s2891_s2 + $0x84] sm:$0xf] %vm1447_vm4, %v1416_v8  ;;  %v1363_v15 = vmax.f32 %v1299_v51, 0.0  ;;  %v1423_v6 = vpack.c.bf16 %v1359_v40, %v1359_v40  ;;  %v1231_v42 = vsub.f32 %v2925_v30, %v2435_v22  ;;  %v1304_v23 = vmul.f32 %v2443_v45, %v1229_v44  ;;  %v2933_v40 = vld [vmem:[#allocation17_spill] sm:$0xff] }
 0x1d8   :  { %1482 = vst.msk [vmem:[%s2891_s2 + $0x88] sm:$0xf] %vm1447_vm4, %v1417_v57  ;;  %v1364_v26 = vmax.f32 %v1300_v29, 0.0  ;;  %v1424_v62 = vpack.c.bf16 %v1360_v41, %v1360_v41  ;;  %v1232_v33 = vsub.f32 %v2926_v10, %v2435_v22  ;;  %v1305_v47 = vmul.f32 %v2443_v45, %v1230_v55 }
 0x1d9   :  { %1483 = vst.msk [vmem:[%s2891_s2 + $0x8c] sm:$0xf] %vm1447_vm4, %v1418_v25  ;;  %v1365_v34 = vmax.f32 %v1301_v50, 0.0  ;;  %v1425_v61 = vpack.c.bf16 %v1361_v48, %v1361_v48  ;;  %v1233_v35 = vsub.f32 %v2927_v46, %v2435_v22  ;;  %v1306_v49 = vmul.f32 %v2443_v45, %v1231_v42 }
 0x1da   :  { %1484 = vst.msk [vmem:[%s2891_s2 + $0x90] sm:$0xf] %vm1447_vm4, %v1419_v11  ;;  %v1366_v43 = vmax.f32 %v1302_v1, 0.0  ;;  %v1426_v3 = vpack.c.bf16 %v1362_v9, %v1362_v9  ;;  %v1234_v56 = vsub.f32 %v2928_v0, %v2435_v22  ;;  %v1307_v28 = vmul.f32 %v2443_v45, %v1232_v33 }
 0x1db   :  { %1485 = vst.msk [vmem:[%s2891_s2 + $0x94] sm:$0xf] %vm1447_vm4, %v1420_v52  ;;  %v1367_v18 = vmax.f32 %v1303_v16, 0.0  ;;  %v1427_v53 = vpack.c.bf16 %v1363_v15, %v1363_v15  ;;  %v1235_v39 = vsub.f32 %v2929_v27, %v2435_v22  ;;  %v1308_v24 = vmul.f32 %v2443_v45, %v1233_v35  ;;  %v2934_v52 = vld [vmem:[#allocation18_spill] sm:$0xff] }
 0x1dc   :  { %1486 = vst.msk [vmem:[%s2891_s2 + $0x98] sm:$0xf] %vm1447_vm4, %v1421_v60  ;;  %v1368_v7 = vmax.f32 %v1304_v23, 0.0  ;;  %v1428_v2 = vpack.c.bf16 %v1364_v26, %v1364_v26  ;;  %v1236_v37 = vsub.f32 %v2930_v32, %v2435_v22  ;;  %v1309_v21 = vmul.f32 %v2443_v45, %v1234_v56  ;;  %v2935_v60 = vld [vmem:[#allocation19_spill] sm:$0xff] }
 0x1dd   :  { %1487 = vst.msk [vmem:[%s2891_s2 + $0x9c] sm:$0xf] %vm1447_vm4, %v1422_v5  ;;  %v1369_v36 = vmax.f32 %v1305_v47, 0.0  ;;  %v1429_v8 = vpack.c.bf16 %v1365_v34, %v1365_v34  ;;  %v1237_v12 = vsub.f32 %v2931_v54, %v2435_v22  ;;  %v1310_v38 = vmul.f32 %v2443_v45, %v1235_v39 }
 0x1de   :  { %1488 = vst.msk [vmem:[%s2891_s2 + $0xa0] sm:$0xf] %vm1447_vm4, %v1423_v6  ;;  %v1370_v57 = vmax.f32 %v1306_v49, 0.0  ;;  %v1430_v4 = vpack.c.bf16 %v1366_v43, %v1366_v43  ;;  %v1238_v17 = vsub.f32 %v2932_v14, %v2435_v22  ;;  %v1311_v25 = vmul.f32 %v2443_v45, %v1236_v37 }
 0x1df   :  { %1489 = vst.msk [vmem:[%s2891_s2 + $0xa4] sm:$0xf] %vm1447_vm4, %v1424_v62  ;;  %v1371_v20 = vmax.f32 %v1307_v28, 0.0  ;;  %v1431_v51 = vpack.c.bf16 %v1367_v18, %v1367_v18  ;;  %v1239_v11 = vsub.f32 %v2933_v40, %v2435_v22  ;;  %v1312_v31 = vmul.f32 %v2443_v45, %v1237_v12  ;;  %v2937_v62 = vld [vmem:[#allocation20_spill] sm:$0xff] }
 0x1e0   :  { %1490 = vst.msk [vmem:[%s2891_s2 + $0xa8] sm:$0xf] %vm1447_vm4, %v1425_v61  ;;  %v1372_v29 = vmax.f32 %v1308_v24, 0.0  ;;  %v1432_v41 = vpack.c.bf16 %v1368_v7, %v1368_v7  ;;  %v1240_v63 = vsub.f32 %v2934_v52, %v2435_v22  ;;  %v1313_v58 = vmul.f32 %v2443_v45, %v1238_v17 }
 0x1e1   :  { %1491 = vst.msk [vmem:[%s2891_s2 + $0xac] sm:$0xf] %vm1447_vm4, %v1426_v3  ;;  %v1373_v50 = vmax.f32 %v1309_v21, 0.0  ;;  %v1433_v48 = vpack.c.bf16 %v1369_v36, %v1369_v36  ;;  %v1241_v19 = vsub.f32 %v2935_v60, %v2435_v22  ;;  %v1314_v44 = vmul.f32 %v2443_v45, %v1239_v11 }
 0x1e2   :  { %1492 = vst.msk [vmem:[%s2891_s2 + $0xb0] sm:$0xf] %vm1447_vm4, %v1427_v53  ;;  %v1374_v1 = vmax.f32 %v1310_v38, 0.0  ;;  %v1434_v9 = vpack.c.bf16 %v1370_v57, %v1370_v57  ;;  %v1315_v5 = vmul.f32 %v2443_v45, %v1240_v63  ;;  %v1375_v13 = vmax.f32 %v1311_v25, 0.0 }
 0x1e3   :  { %1493 = vst.msk [vmem:[%s2891_s2 + $0xb4] sm:$0xf] %vm1447_vm4, %v1428_v2  ;;  %v1435_v55 = vpack.c.bf16 %v1371_v20, %v1371_v20  ;;  %v1316_v16 = vmul.f32 %v2443_v45, %v1241_v19  ;;  %v1376_v15 = vmax.f32 %v1312_v31, 0.0  ;;  %v1436_v6 = vpack.c.bf16 %v1372_v29, %v1372_v29 }
 0x1e4   :  { %1494 = vst.msk [vmem:[%s2891_s2 + $0xb8] sm:$0xf] %vm1447_vm4, %v1429_v8  ;;  %v2936_v30 = vsub.f32 %v2412_v59, %v2435_v22  ;;  %v1377_v23 = vmax.f32 %v1313_v58, 0.0  ;;  %v1437_v26 = vpack.c.bf16 %v1373_v50, %v1373_v50  ;;  %v2938_v10 = vsub.f32 %v2937_v62, %v2435_v22 }
 0x1e5   :  { %1495 = vst.msk [vmem:[%s2891_s2 + $0xbc] sm:$0xf] %vm1447_vm4, %v1430_v4  ;;  %v1378_v47 = vmax.f32 %v1314_v44, 0.0  ;;  %v1438_v34 = vpack.c.bf16 %v1374_v1, %v1374_v1  ;;  %v1379_v59 = vmax.f32 %v1315_v5, 0.0  ;;  %v1439_v61 = vpack.c.bf16 %v1375_v13, %v1375_v13 }
 0x1e6   :  { %1496 = vst.msk [vmem:[%s2891_s2 + $0xc0] sm:$0xf] %vm1447_vm4, %v1431_v51  ;;  %v1317_v42 = vmul.f32 %v2443_v45, %v2936_v30  ;;  %v1318_v33 = vmul.f32 %v2443_v45, %v2938_v10  ;;  %v1380_v46 = vmax.f32 %v1316_v16, 0.0  ;;  %v1440_v35 = vpack.c.bf16 %v1376_v15, %v1376_v15 }
 0x1e7   :  { %1497 = vst.msk [vmem:[%s2891_s2 + $0xc4] sm:$0xf] %vm1447_vm4, %v1432_v41  ;;  %v1441_v45 = vpack.c.bf16 %v1377_v23, %v1377_v23  ;;  %v1442_v43 = vpack.c.bf16 %v1378_v47, %v1378_v47  ;;  %v1443_v3 = vpack.c.bf16 %v1379_v59, %v1379_v59 }
 0x1e8   :  { %1498 = vst.msk [vmem:[%s2891_s2 + $0xc8] sm:$0xf] %vm1447_vm4, %v1433_v48  ;;  %v1381_v22 = vmax.f32 %v1317_v42, 0.0  ;;  %v1382_v49 = vmax.f32 %v1318_v33, 0.0  ;;  %v1444_v0 = vpack.c.bf16 %v1380_v46, %v1380_v46 }
 0x1e9   :  { %1499 = vst.msk [vmem:[%s2891_s2 + $0xcc] sm:$0xf] %vm1447_vm4, %v1434_v9 }
 0x1ea   :  { %1500 = vst.msk [vmem:[%s2891_s2 + $0xd0] sm:$0xf] %vm1447_vm4, %v1435_v55  ;;  %v1445_v56 = vpack.c.bf16 %v1381_v22, %v1381_v22  ;;  %v1446_v28 = vpack.c.bf16 %v1382_v49, %v1382_v49 }
 0x1eb   :  { %1501 = vst.msk [vmem:[%s2891_s2 + $0xd4] sm:$0xf] %vm1447_vm4, %v1436_v6 }
 0x1ec   :  { %1502 = vst.msk [vmem:[%s2891_s2 + $0xd8] sm:$0xf] %vm1447_vm4, %v1437_v26 }
 0x1ed   :  { %1503 = vst.msk [vmem:[%s2891_s2 + $0xdc] sm:$0xf] %vm1447_vm4, %v1438_v34 }
 0x1ee   :  { %1504 = vst.msk [vmem:[%s2891_s2 + $0xe0] sm:$0xf] %vm1447_vm4, %v1439_v61 }
 0x1ef   :  { %1505 = vst.msk [vmem:[%s2891_s2 + $0xe4] sm:$0xf] %vm1447_vm4, %v1440_v35 }
 0x1f0   :  { %1506 = vst.msk [vmem:[%s2891_s2 + $0xe8] sm:$0xf] %vm1447_vm4, %v1441_v45 }
 0x1f1   :  { %1507 = vst.msk [vmem:[%s2891_s2 + $0xec] sm:$0xf] %vm1447_vm4, %v1442_v43 }
 0x1f2   :  { %1508 = vst.msk [vmem:[%s2891_s2 + $0xf0] sm:$0xf] %vm1447_vm4, %v1443_v3 }
 0x1f3   :  { %1509 = vst.msk [vmem:[%s2891_s2 + $0xf4] sm:$0xf] %vm1447_vm4, %v1444_v0 }
 0x1f4   :  { %1510 = vst.msk [vmem:[%s2891_s2 + $0xf8] sm:$0xf] %vm1447_vm4, %v1445_v56 }
 0x1f5   :  { %1511 = vst.msk [vmem:[%s2891_s2 + $0xfc] sm:$0xf] %vm1447_vm4, %v1446_v28 }
 0x1f6   :  { %1516 = vsyncpa [#allocation4], 1 }

</bundles_post_ra>
